<compile_context>
chip_gen: v6e
topology: v6e:2x2x1
jax: 0.10.0
libtpu: 0.0.40
codegen_flags: <defaults>
</compile_context>

<pallas_src>
import functools

import numpy as np
import jax
import jax.numpy as jnp
from jax import lax
from jax.experimental import pallas as pl
from jax.experimental.pallas import tpu as pltpu


def _round_up(x: int, m: int) -> int:
    return ((x + m - 1) // m) * m


def adaptive_pool_matrix(in_size: int, out_size: int) -> np.ndarray:
    """(out_size, in_size) matrix M with M[i, j] = 1/|win_i| for j in win_i.

    Uses the same floor/ceil window bounds as torch.nn.AdaptiveAvgPool2d.
    """
    P = np.zeros((out_size, in_size), dtype=np.float32)
    for i in range(out_size):
        start = (i * in_size) // out_size
        end = -(-((i + 1) * in_size) // out_size)  # ceil((i+1)*in/out)
        P[i, start:end] = 1.0 / float(end - start)
    return P


@functools.lru_cache(maxsize=None)
def _pool_weight(H: int, W: int, OH: int, OW: int) -> jax.Array:
    """Folded (H*W, OH*OW) f32 pooling matrix, cached on device across calls."""
    ph = adaptive_pool_matrix(H, OH)                 # (OH, H)
    pw = adaptive_pool_matrix(W, OW)                 # (OW, W)
    w = np.ascontiguousarray(np.kron(ph, pw).T)      # (H*W, OH*OW)
    return jnp.asarray(w)


def _pool_kernel(w_ref, x_ref, o_ref, *, precision):
    # w_ref: (H*W, OH*OW) f32 folded pooling matrix (constant across grid)
    # x_ref: (TB, H*W) plane batch (large contiguous DMA; MXU M = TB)
    # o_ref: (TB, OH*OW) pooled output (lane-dense 169-wide slab)
    x = x_ref[...].astype(jnp.float32)
    o_ref[...] = jnp.dot(
        x, w_ref[...],
        preferred_element_type=jnp.float32,
        precision=precision,
    ).astype(o_ref.dtype)


# Scoped-VMEM numbers used for block sizing and the explicit compiler limit.
# 48 MiB is safe on every generation (v7x physical VMEM is 64 MiB per core,
# v5e/v6e have 128 MiB) and well above v5e's 16 MiB *default* scoped limit.
_VMEM_LIMIT_BYTES = 48 * 1024 * 1024
_VMEM_BLOCK_BUDGET = 40 * 1024 * 1024     # headroom left for compiler scratch
_TARGET_X_BLOCK_BYTES = 8 * 1024 * 1024   # padded input bytes per grid step


def ginka_output_forward(x: jax.Array, out_size=(13, 13)) -> jax.Array:
    """Forward pass of GinkaOutput: adaptive average pool over H, W (NCHW)."""
    N, C, H, W = x.shape
    OH, OW = out_size
    planes = N * C
    HW, O = H * W, OH * OW

    w_kron = _pool_weight(H, W, OH, OW)    # (HW, O) f32, cached on device
    x_flat = x.reshape(planes, HW)         # contiguous reshape, free

    itemsize = jnp.dtype(x.dtype).itemsize
    # Sublane packing of the second-to-last block dim: 8 f32 / 16 bf16 / 32 i8.
    sub = max(8, 32 // itemsize)

    # Padding-aware VMEM accounting (lanes pad to 128, f32 sublanes to 8).
    k_pad = _round_up(HW, 128)                    # x block last dim
    o_pad = _round_up(O, 128)                     # out block last dim (169->256)
    w_bytes = _round_up(HW, 8) * o_pad * 4        # pooling matrix, f32
    row_bytes = 2 * (k_pad + o_pad) * itemsize    # dbl-buffered x + out per row

    # Budget the weight as double-buffered so the compatibility fallback
    # (no Buffered(1)) also fits; single-buffering only adds slack.
    avail = _VMEM_BLOCK_BUDGET - 2 * w_bytes
    if avail <= row_bytes:
        # TODO(synk): for very large planes (H*W >~ 16K) the folded weight no
        # longer fits VMEM; a K-tiled grid axis over H*W with an f32
        # accumulator would be needed. Not required for GinkaOutput's shapes.
        avail = row_bytes * sub
    tb = max(1, min(_TARGET_X_BLOCK_BYTES // (k_pad * itemsize),
                    avail // row_bytes,
                    planes))
    if tb < planes:
        tb = max(sub, (tb // sub) * sub)          # sublane-aligned block rows
        tb = min(tb, planes)

    grid = (pl.cdiv(planes, tb),)
    compiler_params = pltpu.CompilerParams(
        dimension_semantics=("parallel",),        # megacore sharding on v7x
        vmem_limit_bytes=_VMEM_LIMIT_BYTES,
    )

    def build(weight_pipeline_mode, precision):
        return pl.pallas_call(
            functools.partial(_pool_kernel, precision=precision),
            out_shape=jax.ShapeDtypeStruct((planes, O), x.dtype),
            grid_spec=pltpu.PrefetchScalarGridSpec(
                num_scalar_prefetch=0,
                grid=grid,
                in_specs=[
                    # Folded pooling matrix: full array, constant index_map.
                    pl.BlockSpec((HW, O), lambda i: (0, 0),
                                 pipeline_mode=weight_pipeline_mode),
                    # TB planes per grid step.
                    pl.BlockSpec((tb, HW), lambda i: (i, 0)),
                ],
                out_specs=pl.BlockSpec((tb, O), lambda i: (i, 0)),
            ),
            compiler_params=compiler_params,
        )

    try:
        # Preferred config: single-buffered constant weight + explicit HIGHEST
        # f32 precision (parity with PyTorch f32 adaptive pooling).
        out_flat = build(pl.Buffered(1), lax.Precision.HIGHEST)(w_kron, x_flat)
    except Exception:
        # Compatibility fallback for Pallas/Mosaic versions that reject
        # Buffered(1) or an explicit precision on the TPU dot lowering.
        out_flat = build(None, None)(w_kron, x_flat)

    return out_flat.reshape(N, C, OH, OW)


def _reference(x: jax.Array, out_size=(13, 13)) -> jax.Array:
    N, C, H, W = x.shape
    OH, OW = out_size
    ph = jnp.asarray(adaptive_pool_matrix(H, OH))
    pw = jnp.asarray(adaptive_pool_matrix(W, OW))
    return jnp.einsum("oh,nchw,pw->ncop", ph, x.astype(jnp.float32),
                      pw).astype(x.dtype)


if __name__ == "__main__":
    key = jax.random.PRNGKey(0)
    x = jax.random.normal(key, (2, 4, 16, 16), dtype=jnp.float32)

    out = ginka_output_forward(x, out_size=(13, 13))
    out = jax.block_until_ready(out)

    ref = _reference(x, out_size=(13, 13))
    assert out.shape == (2, 4, 13, 13), out.shape
    err = float(jnp.max(jnp.abs(out - ref)))
    assert err < 1e-4, f"max abs err {err}"

    print("KERNEL_OK")
</pallas_src>

<mosaic_0001>
module attributes {stable_mosaic.version = 11 : i64} {
  func.func @_pool_kernel(%arg0: i32, %arg1: memref<256x169xf32, #tpu.memory_space<vmem>>, %arg2: memref<8x256xf32, #tpu.memory_space<vmem>>, %arg3: memref<8x169xf32, #tpu.memory_space<vmem>>) attributes {dimension_semantics = [#tpu.dimension_semantics<parallel>], iteration_bounds = array<i64: 1>, scalar_prefetch = 0 : i64, scratch_operands = 0 : i64, tpu.core_type = #tpu.core_type<tc>, window_params = [{pipeline_mode = #tpu.pipeline_mode<synchronous>, transform_indices = @transform_0, window_bounds = array<i64: 256, 169>}, {transform_indices = @transform_1, window_bounds = array<i64: 8, 256>}, {transform_indices = @transform_2, window_bounds = array<i64: 8, 169>}]} {
    %c0 = arith.constant 0 : index
    %c0_0 = arith.constant 0 : index
    %0 = vector.load %arg2[%c0, %c0_0] : memref<8x256xf32, #tpu.memory_space<vmem>>, vector<8x256xf32>
    %c0_1 = arith.constant 0 : index
    %c0_2 = arith.constant 0 : index
    %1 = vector.load %arg1[%c0_1, %c0_2] : memref<256x169xf32, #tpu.memory_space<vmem>>, vector<256x169xf32>
    %cst = arith.constant dense<0.000000e+00> : vector<8x169xf32>
    %2 = tpu.matmul %0, %1, %cst {dimension_numbers = #tpu.dot_dimension_numbers<[1], [0], [0], [1], [0, 0, 1, 1], [], []>, precision = #tpu.contract_precision<fp32>} : vector<8x256xf32>, vector<256x169xf32>, vector<8x169xf32> -> vector<8x169xf32>
    %c0_3 = arith.constant 0 : index
    %c0_4 = arith.constant 0 : index
    %3 = vector.load %arg3[%c0_3, %c0_4] : memref<8x169xf32, #tpu.memory_space<vmem>>, vector<8x169xf32>
    tpu.vector_store %arg3[%c0_3, %c0_4], %2 {strides = array<i32>} : memref<8x169xf32, #tpu.memory_space<vmem>>, vector<8x169xf32>,
    return
  }
  func.func @transform_0(%arg0: i32) -> (i32, i32) {
    %c0_i32 = arith.constant 0 : i32
    %c0_i32_0 = arith.constant 0 : i32
    %c0_i32_1 = arith.constant 0 : i32
    return %c0_i32, %c0_i32_0 : i32, i32
  }
  func.func @transform_1(%arg0: i32) -> (i32, i32) {
    %c0_i32 = arith.constant 0 : i32
    %c0_i32_0 = arith.constant 0 : i32
    return %arg0, %c0_i32 : i32, i32
  }
  func.func @transform_2(%arg0: i32) -> (i32, i32) {
    %c0_i32 = arith.constant 0 : i32
    %c0_i32_0 = arith.constant 0 : i32
    return %arg0, %c0_i32 : i32, i32
  }
}

module attributes {stable_mosaic.version = 11 : i64} {
  func.func @_pool_kernel(%arg0: i32, %arg1: memref<256x169xf32, #tpu.memory_space<vmem>>, %arg2: memref<8x256xf32, #tpu.memory_space<vmem>>, %arg3: memref<8x169xf32, #tpu.memory_space<vmem>>) attributes {dimension_semantics = [#tpu.dimension_semantics<parallel>], iteration_bounds = array<i64: 1>, scalar_prefetch = 0 : i64, scratch_operands = 0 : i64, tpu.core_type = #tpu.core_type<tc>, window_params = [{pipeline_mode = #tpu.pipeline_mode<synchronous>, transform_indices = @transform_0, window_bounds = array<i64: 256, 169>}, {transform_indices = @transform_1, window_bounds = array<i64: 8, 256>}, {transform_indices = @transform_2, window_bounds = array<i64: 8, 169>}]} {
    %c0 = arith.constant 0 : index
    %c0_0 = arith.constant 0 : index
    %0 = vector.load %arg2[%c0, %c0_0] : memref<8x256xf32, #tpu.memory_space<vmem>>, vector<8x256xf32>
    %c0_1 = arith.constant 0 : index
    %c0_2 = arith.constant 0 : index
    %1 = vector.load %arg1[%c0_1, %c0_2] : memref<256x169xf32, #tpu.memory_space<vmem>>, vector<256x169xf32>
    %cst = arith.constant dense<0.000000e+00> : vector<8x169xf32>
    %2 = tpu.matmul %0, %1, %cst {dimension_numbers = #tpu.dot_dimension_numbers<[1], [0], [0], [1], [0, 0, 1, 1], [], []>} : vector<8x256xf32>, vector<256x169xf32>, vector<8x169xf32> -> vector<8x169xf32>
    %c0_3 = arith.constant 0 : index
    %c0_4 = arith.constant 0 : index
    %3 = vector.load %arg3[%c0_3, %c0_4] : memref<8x169xf32, #tpu.memory_space<vmem>>, vector<8x169xf32>
    tpu.vector_store %arg3[%c0_3, %c0_4], %2 {strides = array<i32>} : memref<8x169xf32, #tpu.memory_space<vmem>>, vector<8x169xf32>,
    return
  }
  func.func @transform_0(%arg0: i32) -> (i32, i32) {
    %c0_i32 = arith.constant 0 : i32
    %c0_i32_0 = arith.constant 0 : i32
    %c0_i32_1 = arith.constant 0 : i32
    return %c0_i32, %c0_i32_0 : i32, i32
  }
  func.func @transform_1(%arg0: i32) -> (i32, i32) {
    %c0_i32 = arith.constant 0 : i32
    %c0_i32_0 = arith.constant 0 : i32
    return %arg0, %c0_i32 : i32, i32
  }
  func.func @transform_2(%arg0: i32) -> (i32, i32) {
    %c0_i32 = arith.constant 0 : i32
    %c0_i32_0 = arith.constant 0 : i32
    return %arg0, %c0_i32 : i32, i32
  }
}

</mosaic_0001>

<bundles_post_ra>
// kernel: tpu_custom_call.1
= control target key start
LH: loop header
LB: loop body
LE: loop exit
PB: predicated region body
PF: predicated region fallthrough
CT: control target
= control target key end

     0   :  { %s2829_s0 = inlined_call_operand.vmem [shape: f32[256,169], index: 0, kind: input, shape index: {}]   ;;  %s2830_s1 = inlined_call_operand.vmem [shape: f32[8,256], index: 1, kind: input, shape index: {}]   ;;  %s2831_s2 = inlined_call_operand.hbm [shape: f32[8,169], index: 2, kind: output, shape index: {}]  }
   0x1   :  { %v45_v0 = vld [vmem:[%s2829_s0 + $0xf8] sm:$0xff]  ;;  %v44_v1 = vld [vmem:[%s2829_s0 + $0xf0] sm:$0xff]  ;;  %v43_v2 = vld [vmem:[%s2829_s0 + $0xe8] sm:$0xff] }
   0x2   :  { %v1427_v3 = vand.u32 4294901760, %v45_v0  ;;  %v1429_v4 = vand.u32 4294901760, %v44_v1  ;;  %v1431_v5 = vand.u32 4294901760, %v43_v2  ;;  %v42_v6 = vld [vmem:[%s2829_s0 + $0xe0] sm:$0xff]  ;;  %v41_v7 = vld [vmem:[%s2829_s0 + $0xd8] sm:$0xff]  ;;  %v40_v8 = vld [vmem:[%s2829_s0 + $0xd0] sm:$0xff] }
   0x3   :  { %v1442_v9 = vand.u32 4294901760, %v42_v6  ;;  %v1444_v10 = vand.u32 4294901760, %v41_v7  ;;  %v1446_v11 = vand.u32 4294901760, %v40_v8  ;;  %v39_v12 = vld [vmem:[%s2829_s0 + $0xc8] sm:$0xff]  ;;  %v38_v13 = vld [vmem:[%s2829_s0 + $0xc0] sm:$0xff]  ;;  %v37_v14 = vld [vmem:[%s2829_s0 + $0xb8] sm:$0xff] }
   0x4   :  { %79 = vmatprep.subr.mxu0 %v1427_v3  ;;  %v1458_v15 = vand.u32 4294901760, %v39_v12  ;;  %v1460_v16 = vand.u32 4294901760, %v38_v13  ;;  %v1462_v17 = vand.u32 4294901760, %v37_v14  ;;  %v1465_v18 = vsub.f32 %v45_v0, %v1427_v3  ;;  %v1470_v19 = vld [vmem:[%s2829_s0 + $0xb0] sm:$0xff]  ;;  %v1475_v20 = vld [vmem:[%s2829_s0 + $0xa8] sm:$0xff]  ;;  %v1480_v21 = vld [vmem:[%s2829_s0 + $0xa0] sm:$0xff] }
   0x5   :  { %81 = vmatpush1.msra.mxu0 %v1429_v4  ;;  %v1484_v22 = vand.u32 4294901760, %v1470_v19  ;;  %v1487_v23 = vsub.f32 %v44_v1, %v1429_v4  ;;  %v1490_v24 = vand.u32 4294901760, %v1475_v20  ;;  %v1493_v25 = vsub.f32 %v43_v2, %v1431_v5  ;;  %v1498_v26 = vld [vmem:[%s2829_s0 + $0x98] sm:$0xff]  ;;  %v1503_v27 = vld [vmem:[%s2829_s0 + $0x90] sm:$0xff]  ;;  %v1508_v28 = vld [vmem:[%s2829_s0 + $0x88] sm:$0xff] }
   0x6   :  { %83 = vmatprep.subr.mxu0 %v1431_v5  ;;  %v2845_v29 = vand.u32 4294901760, %v1465_v18  ;;  %v1513_v30 = vand.u32 4294901760, %v1480_v21  ;;  %v1516_v31 = vsub.f32 %v42_v6, %v1442_v9  ;;  %v1519_v32 = vand.u32 4294901760, %v1498_v26  ;;  %v1533_v37 = vld [vmem:[%s2829_s0 + $0x80] sm:$0xff]  ;;  %v1560_v46 = vld [vmem:[%s2829_s0 + $0x78] sm:$0xff]  ;;  %v1573_v51 = vld [vmem:[%s2829_s0 + $0x70] sm:$0xff] }
   0x7   :  { %85 = vmatpush1.msra.mxu0 %v1442_v9  ;;  %v2844_v33 = vand.u32 4294901760, %v1487_v23  ;;  %v2842_v34 = vand.u32 4294901760, %v1493_v25  ;;  %v1525_v35 = vsub.f32 %v41_v7, %v1444_v10  ;;  %v1528_v36 = vand.u32 4294901760, %v1503_v27  ;;  %v1583_v56 = vld [vmem:[%s2829_s0 + $0x68] sm:$0xff]  ;;  %v1598_v61 = vld [vmem:[%s2829_s0 + $0x60] sm:$0xff]  ;;  %v1613_v2 = vld [vmem:[%s2829_s0 + $0x58] sm:$0xff] }
   0x8   :  { %3042 = vst [vmem:[#allocation5_spill] sm:$0xff] %v1513_v30  ;;  %3043 = vst [vmem:[#allocation6_spill] sm:$0xff] %v1519_v32  ;;  %87 = vmatprep.subr.mxu0 %v1444_v10  ;;  %v226_v38 = vsub.f32 %v1465_v18, %v2845_v29  ;;  %v2841_v39 = vand.u32 4294901760, %v1516_v31  ;;  %v1541_v40 = vsub.f32 %v40_v8, %v1446_v11  ;;  %v1544_v41 = vand.u32 4294901760, %v1508_v28 }
   0x9   :  { %3044 = vst [vmem:[#allocation7_spill] sm:$0xff] %v1528_v36  ;;  %89 = vmatpush1.msra.mxu0 %v1446_v11  ;;  %v232_v42 = vsub.f32 %v1487_v23, %v2844_v33  ;;  %v238_v43 = vsub.f32 %v1493_v25, %v2842_v34  ;;  %v2839_v44 = vand.u32 4294901760, %v1525_v35  ;;  %v1555_v45 = vsub.f32 %v39_v12, %v1458_v15  ;;  %v1749_v33 = vld [vmem:[%s2829_s0 + $0x18] sm:$0xff] }
   0xa   :  { %3045 = vst [vmem:[#allocation8_spill] sm:$0xff] %v1544_v41  ;;  %91 = vmatprep.subr.mxu0 %v1458_v15  ;;  %v227_v47 = vand.u32 4294901760, %v226_v38  ;;  %v244_v48 = vsub.f32 %v1516_v31, %v2841_v39  ;;  %v2837_v49 = vand.u32 4294901760, %v1541_v40  ;;  %v1568_v50 = vand.u32 4294901760, %v1533_v37 }
   0xb   :  { %93 = vmatpush1.msra.mxu0 %v1460_v16  ;;  %v233_v52 = vand.u32 4294901760, %v232_v42  ;;  %v239_v53 = vand.u32 4294901760, %v238_v43  ;;  %v250_v54 = vsub.f32 %v1525_v35, %v2839_v44  ;;  %v2836_v55 = vand.u32 4294901760, %v1555_v45  ;;  %v1722_v44 = vld [vmem:[%s2829_s0 + $0x28] sm:$0xff] }
   0xc   :  { %3046 = vst [vmem:[#allocation9_spill] sm:$0xff] %v1568_v50  ;;  %95 = vmatprep.subr.mxu0 %v1462_v17  ;;  %228 = vmatprep.subr.mxu1 %v227_v47  ;;  %v245_v57 = vand.u32 4294901760, %v244_v48  ;;  %v256_v58 = vsub.f32 %v1541_v40, %v2837_v49  ;;  %v1590_v59 = vsub.f32 %v38_v13, %v1460_v16  ;;  %v1593_v60 = vand.u32 4294901760, %v1560_v46  ;;  %v1627_v13 = vld [vmem:[%s2829_s0 + $0x50] sm:$0xff] }
   0xd   :  { %97 = vmatpush1.msra.mxu0 %v1484_v22  ;;  %234 = vmatpush1.msra.mxu1 %v233_v52  ;;  %v251_v62 = vand.u32 4294901760, %v250_v54  ;;  %v262_v63 = vsub.f32 %v1555_v45, %v2836_v55  ;;  %v1605_v0 = vsub.f32 %v37_v14, %v1462_v17  ;;  %v1608_v1 = vand.u32 4294901760, %v1573_v51  ;;  %v1706_v49 = vld [vmem:[%s2829_s0 + $0x30] sm:$0xff] }
   0xe   :  { %3047 = vst [vmem:[#allocation10_spill] sm:$0xff] %v1593_v60  ;;  %99 = vmatprep.subr.mxu0 %v1490_v24  ;;  %240 = vmatprep.subr.mxu1 %v239_v53  ;;  %v257_v6 = vand.u32 4294901760, %v256_v58  ;;  %v2834_v7 = vand.u32 4294901760, %v1590_v59  ;;  %v1619_v8 = vsub.f32 %v1470_v19, %v1484_v22  ;;  %v1622_v12 = vand.u32 4294901760, %v1583_v56 }
   0xf   :  { %3048 = vst [vmem:[#allocation11_spill] sm:$0xff] %v1608_v1  ;;  %101 = vmatpush1.msra.mxu0 %v1513_v30  ;;  %246 = vmatpush1.msra.mxu1 %v245_v57  ;;  %v263_v14 = vand.u32 4294901760, %v262_v63  ;;  %v2832_v38 = vand.u32 4294901760, %v1605_v0  ;;  %v1633_v42 = vsub.f32 %v1475_v20, %v1490_v24  ;;  %v1636_v19 = vand.u32 4294901760, %v1598_v61  ;;  %v1653_v20 = vld [vmem:[%s2829_s0 + $0x48] sm:$0xff] }
  0x10   :  { %3049 = vst [vmem:[#allocation12_spill] sm:$0xff] %v1622_v12  ;;  %103 = vmatprep.subr.mxu0 %v1519_v32  ;;  %252 = vmatprep.subr.mxu1 %v251_v62  ;;  %v268_v43 = vsub.f32 %v1590_v59, %v2834_v7  ;;  %v2833_v47 = vand.u32 4294901760, %v1619_v8  ;;  %v1645_v48 = vsub.f32 %v1480_v21, %v1513_v30  ;;  %v1648_v52 = vand.u32 4294901760, %v1613_v2 }
  0x11   :  { %3050 = vst [vmem:[#allocation13_spill] sm:$0xff] %v1636_v19  ;;  %105 = vmatpush1.msra.mxu0 %v1528_v36  ;;  %258 = vmatpush1.msra.mxu1 %v257_v6  ;;  %v274_v53 = vsub.f32 %v1605_v0, %v2832_v38  ;;  %v2835_v54 = vand.u32 4294901760, %v1633_v42  ;;  %v1662_v21 = vsub.f32 %v1498_v26, %v1519_v32  ;;  %v1665_v57 = vand.u32 4294901760, %v1627_v13  ;;  %v1679_v26 = vld [vmem:[%s2829_s0 + $0x40] sm:$0xff] }
  0x12   :  { %3051 = vst [vmem:[#allocation14_spill] sm:$0xff] %v1648_v52  ;;  %107 = vmatprep.subr.mxu0 %v1544_v41  ;;  %264 = vmatprep.subr.mxu1 %v263_v14  ;;  %v269_v58 = vand.u32 4294901760, %v268_v43  ;;  %v280_v62 = vsub.f32 %v1619_v8, %v2833_v47  ;;  %v2838_v63 = vand.u32 4294901760, %v1645_v48  ;;  %v1674_v6 = vsub.f32 %v1503_v27, %v1528_v36  ;;  %v1692_v27 = vld [vmem:[%s2829_s0 + $0x38] sm:$0xff] }
  0x13   :  { %3052 = vst [vmem:[#allocation15_spill] sm:$0xff] %v1665_v57  ;;  %109 = vmatpush1.msra.mxu0 %v1568_v50  ;;  %v275_v38 = vand.u32 4294901760, %v274_v53  ;;  %v286_v14 = vsub.f32 %v1633_v42, %v2835_v54  ;;  %v2840_v43 = vand.u32 4294901760, %v1662_v21  ;;  %v1687_v47 = vand.u32 4294901760, %v1653_v20 }
  0x14   :  { %270 = vmatpush1.msra.mxu1 %v269_v58  ;;  %111 = vmatprep.subr.mxu0 %v1593_v60  ;;  %v281_v7 = vand.u32 4294901760, %v280_v62  ;;  %v292_v53 = vsub.f32 %v1645_v48, %v2838_v63  ;;  %v2843_v54 = vand.u32 4294901760, %v1674_v6  ;;  %v1701_v55 = vsub.f32 %v1508_v28, %v1544_v41 }
  0x15   :  { %3053 = vst [vmem:[#allocation16_spill] sm:$0xff] %v1687_v47  ;;  %276 = vmatprep.subr.mxu1 %v275_v38  ;;  %113 = vmatpush1.msra.mxu0 %v1608_v1  ;;  %v287_v58 = vand.u32 4294901760, %v286_v14  ;;  %v298_v62 = vsub.f32 %v1662_v21, %v2840_v43  ;;  %v1713_v63 = vand.u32 4294901760, %v1679_v26  ;;  %v1717_v28 = vsub.f32 %v1533_v37, %v1568_v50  ;;  %v1735_v37 = vld [vmem:[%s2829_s0 + $0x20] sm:$0xff] }
  0x16   :  { %282 = vmatpush1.msra.mxu1 %v281_v7  ;;  %115 = vmatprep.subr.mxu0 %v1622_v12  ;;  %v293_v38 = vand.u32 4294901760, %v292_v53  ;;  %v304_v14 = vsub.f32 %v1674_v6, %v2843_v54  ;;  %v2848_v43 = vand.u32 4294901760, %v1701_v55  ;;  %v1730_v39 = vand.u32 4294901760, %v1692_v27 }
  0x17   :  { %3054 = vst [vmem:[#allocation17_spill] sm:$0xff] %v1713_v63  ;;  %288 = vmatprep.subr.mxu1 %v287_v58  ;;  %117 = vmatpush1.msra.mxu0 %v1636_v19  ;;  %v299_v7 = vand.u32 4294901760, %v298_v62  ;;  %v2849_v53 = vand.u32 4294901760, %v1717_v28  ;;  %v1741_v34 = vsub.f32 %v1560_v46, %v1593_v60  ;;  %v1744_v54 = vand.u32 4294901760, %v1706_v49 }
  0x18   :  { %3055 = vst [vmem:[#allocation18_spill] sm:$0xff] %v1730_v39 }
  0x19   :  { %3056 = vst [vmem:[#allocation19_spill] sm:$0xff] %v1744_v54 }
  0x1a   :  { %7 = vsyncpa [#allocation3], 0  ;;  %294 = vmatpush1.msra.mxu1 %v293_v38  ;;  %119 = vmatprep.subr.mxu0 %v1648_v52  ;;  %v305_v58 = vand.u32 4294901760, %v304_v14  ;;  %v310_v62 = vsub.f32 %v1701_v55, %v2848_v43  ;;  %v1757_v46 = vsub.f32 %v1573_v51, %v1608_v1  ;;  %v1760_v29 = vand.u32 4294901760, %v1722_v44  ;;  %v1777_v51 = vld [vmem:[%s2829_s0 + $0x10] sm:$0xff]  ;;  %v1860_v36 = vld [vmem:[%s2829_s0 + $0x1e8] sm:$0xff] }
  0x1b   :  { %300 = vmatprep.subr.mxu1 %v299_v7  ;;  %121 = vmatpush1.msra.mxu0 %v1665_v57  ;;  %v316_v38 = vsub.f32 %v1717_v28, %v2849_v53  ;;  %v1769_v60 = vsub.f32 %v1583_v56, %v1622_v12  ;;  %v1772_v43 = vand.u32 4294901760, %v1735_v37  ;;  %v1783_v14 = vsub.f32 %v1598_v61, %v1636_v19  ;;  %v1791_v12 = vld [vmem:[%s2829_s0 + $0x8] sm:$0xff]  ;;  %v1844_v41 = vld [vmem:[%s2829_s0 + $0x1f0] sm:$0xff] }
  0x1c   :  { %3057 = vst [vmem:[#allocation20_spill] sm:$0xff] %v1760_v29  ;;  %306 = vmatpush1.msra.mxu1 %v305_v58  ;;  %123 = vmatprep.subr.mxu0 %v1687_v47  ;;  %v311_v7 = vand.u32 4294901760, %v310_v62  ;;  %v1786_v56 = vand.u32 4294901760, %v1749_v33  ;;  %v3061_v1 = vand.u32 4294901760, %v1741_v34  ;;  %v1800_v61 = vsub.f32 %v1613_v2, %v1648_v52  ;;  %v1817_v2 = vld [vmem:[%s2829_s0] sm:$0xff] }
  0x1d   :  { %3058 = vst [vmem:[#allocation21_spill] sm:$0xff] %v1772_v43  ;;  %3059 = vst [vmem:[#allocation22_spill] sm:$0xff] %v1783_v14  ;;  %125 = vmatpush1.msra.mxu0 %v1713_v63  ;;  %v317_v58 = vand.u32 4294901760, %v316_v38  ;;  %v2866_v53 = vand.u32 4294901760, %v1769_v60  ;;  %v3063_v19 = vand.u32 4294901760, %v1757_v46  ;;  %v1808_v38 = vand.u32 4294901760, %v1777_v51 }
  0x1e   :  { %3060 = vst [vmem:[#allocation23_spill] sm:$0xff] %v1786_v56  ;;  %v322_v62 = vsub.f32 %v1741_v34, %v3061_v1  ;;  %3062 = vst [vmem:[#allocation24_spill] sm:$0xff] %v1800_v61  ;;  %312 = vmatprep.subr.mxu1 %v311_v7  ;;  %127 = vmatprep.subr.mxu0 %v1730_v39  ;;  %v1812_v1 = vsub.f32 %v1627_v13, %v1665_v57  ;;  %v1825_v52 = vand.u32 4294901760, %v1791_v12  ;;  %v1830_v13 = vld [vmem:[%s2829_s0 + $0x1f8] sm:$0xff]  ;;  %vm1363_vm0 = vcmask 334848  }
  0x1f   :  { %v328_v50 = vsub.f32 %v1757_v46, %v3063_v19  ;;  %3064 = vst [vmem:[#allocation25_spill] sm:$0xff] %v1808_v38  ;;  %318 = vmatpush1.msra.mxu1 %v317_v58  ;;  %129 = vmatpush1.msra.mxu0 %v1744_v54  ;;  %v334_v19 = vsub.f32 %v1769_v60, %v2866_v53  ;;  %v3067_v58 = vand.u32 4294901760, %v1783_v14 }
  0x20   :  { %3065 = vst [vmem:[#allocation26_spill] sm:$0xff] %v1812_v1  ;;  %v323_v7 = vand.u32 4294901760, %v322_v62  ;;  %3066 = vst [vmem:[#allocation27_spill] sm:$0xff] %v1825_v52  ;;  %131 = vmatprep.subr.mxu0 %v1760_v29  ;;  %v1839_v53 = vsub.f32 %v1653_v20, %v1687_v47  ;;  %v1855_v20 = vsub.f32 %v1679_v26, %v1713_v63  ;;  %v1873_v26 = vld [vmem:[%s2829_s0 + $0x1e0] sm:$0xff]  ;;  %v1887_v47 = vld [vmem:[%s2829_s0 + $0x1d8] sm:$0xff] }
  0x21   :  { %v329_v57 = vand.u32 4294901760, %v328_v50  ;;  %v340_v62 = vsub.f32 %v1783_v14, %v3067_v58  ;;  %v335_v32 = vand.u32 4294901760, %v334_v19  ;;  %133 = vmatpush1.msra.mxu0 %v1772_v43  ;;  %v3069_v50 = vand.u32 4294901760, %v1800_v61 }
  0x22   :  { %3068 = vst [vmem:[#allocation28_spill] sm:$0xff] %v1839_v53  ;;  %324 = vmatprep.subr.mxu1 %v323_v7  ;;  %v1851_v58 = vand.u32 4294901760, %v1817_v2  ;;  %3071 = vst [vmem:[#allocation30_spill] sm:$0xff] %v1855_v20  ;;  %135 = vmatprep.subr.mxu0 %v1786_v56  ;;  %v3072_v19 = vand.u32 4294901760, %v1812_v1  ;;  %v1907_v14 = vsub.f32 %v1722_v44, %v1760_v29  ;;  %v1924_v44 = vand.u32 4294901760, %v1887_v47  ;;  %v1929_v29 = vld [vmem:[%s2829_s0 + $0x1c8] sm:$0xff] }
  0x23   :  { %v346_v30 = vsub.f32 %v1800_v61, %v3069_v50  ;;  %330 = vmatpush1.msra.mxu1 %v329_v57  ;;  %v341_v7 = vand.u32 4294901760, %v340_v62  ;;  %v1868_v61 = vand.u32 4294901760, %v1830_v13  ;;  %137 = vmatpush1.msra.mxu0 %v1808_v38  ;;  %v1879_v62 = vsub.f32 %v1692_v27, %v1730_v39 }
  0x24   :  { %3070 = vst [vmem:[#allocation29_spill] sm:$0xff] %v1851_v58  ;;  %v352_v50 = vsub.f32 %v1812_v1, %v3072_v19  ;;  %336 = vmatprep.subr.mxu1 %v335_v32  ;;  %v1882_v19 = vand.u32 4294901760, %v1844_v41  ;;  %139 = vmatprep.subr.mxu0 %v1825_v52  ;;  %v1895_v27 = vsub.f32 %v1706_v49, %v1744_v54  ;;  %v1898_v57 = vand.u32 4294901760, %v1860_v36  ;;  %v1915_v49 = vld [vmem:[%s2829_s0 + $0x1d0] sm:$0xff] }
  0x25   :  { %3073 = vst [vmem:[#allocation31_spill] sm:$0xff] %v1868_v61  ;;  %v347_v63 = vand.u32 4294901760, %v346_v30  ;;  %3074 = vst [vmem:[#allocation32_spill] sm:$0xff] %v1879_v62  ;;  %342 = vmatpush1.msra.mxu1 %v341_v7  ;;  %v3076_v30 = vand.u32 4294901760, %v1839_v53  ;;  %141 = vmatpush1.msra.mxu0 %v1851_v58  ;;  %v3079_v39 = vand.u32 4294901760, %v1855_v20 }
  0x26   :  { %3075 = vst [vmem:[#allocation33_spill] sm:$0xff] %v1882_v19  ;;  %v353_v1 = vand.u32 4294901760, %v352_v50  ;;  %3077 = vst [vmem:[#allocation34_spill] sm:$0xff] %v1895_v27  ;;  %143 = vmatprep.subr.mxu0 %v1868_v61  ;;  %v1921_v50 = vsub.f32 %v1735_v37, %v1772_v43  ;;  %v1938_v37 = vsub.f32 %v1749_v33, %v1786_v56  ;;  %v3086_v43 = vand.u32 4294901760, %v1895_v27  ;;  %v1955_v33 = vld [vmem:[%s2829_s0 + $0x1c0] sm:$0xff] }
  0x27   :  { %v358_v32 = vsub.f32 %v1839_v53, %v3076_v30  ;;  %3078 = vst [vmem:[#allocation35_spill] sm:$0xff] %v1898_v57  ;;  %348 = vmatprep.subr.mxu1 %v347_v63  ;;  %v364_v7 = vsub.f32 %v1855_v20, %v3079_v39  ;;  %3080 = vst [vmem:[#allocation36_spill] sm:$0xff] %v1907_v14  ;;  %v1910_v30 = vand.u32 4294901760, %v1873_v26  ;;  %145 = vmatpush2.msra.mxu0 %v1882_v19 }
  0x28   :  { %354 = vmatpush1.msra.mxu1 %v353_v1  ;;  %3082 = vst [vmem:[#allocation38_spill] sm:$0xff] %v1921_v50  ;;  %3083 = vst [vmem:[#allocation39_spill] sm:$0xff] %v1924_v44  ;;  %v3084_v1 = vand.u32 4294901760, %v1879_v62  ;;  %v2897_v39 = vand.u32 4294901760, %v1907_v14  ;;  %v376_v20 = vsub.f32 %v1895_v27, %v3086_v43  ;;  %147 = vmatprep.subr.mxu0 %v1898_v57  ;;  %v1946_v53 = vand.u32 4294901760, %v1915_v49 }
  0x29   :  { %3081 = vst [vmem:[#allocation37_spill] sm:$0xff] %v1910_v30  ;;  %v359_v63 = vand.u32 4294901760, %v358_v32  ;;  %v365_v54 = vand.u32 4294901760, %v364_v7  ;;  %3085 = vst [vmem:[#allocation40_spill] sm:$0xff] %v1938_v37  ;;  %149 = vmatpush2.msra.mxu0 %v1910_v30  ;;  %v1963_v56 = vand.u32 4294901760, %v1929_v29  ;;  %v1977_v7 = vsub.f32 %v1791_v12, %v1825_v52  ;;  %v2025_v52 = vld [vmem:[%s2829_s0 + $0x198] sm:$0xff] }
  0x2a   :  { %v370_v32 = vsub.f32 %v1879_v62, %v3084_v1  ;;  %3087 = vst [vmem:[#allocation41_spill] sm:$0xff] %v1946_v53  ;;  %v1950_v1 = vsub.f32 %v1777_v51, %v1808_v38  ;;  %v382_v43 = vsub.f32 %v1907_v14, %v2897_v39  ;;  %v1968_v51 = vld [vmem:[%s2829_s0 + $0x1b8] sm:$0xff]  ;;  %v377_v38 = vand.u32 4294901760, %v376_v20  ;;  %151 = vmatprep.subr.mxu0 %v1924_v44  ;;  %v1982_v14 = vld [vmem:[%s2829_s0 + $0x1b0] sm:$0xff]  ;;  %v1998_v39 = vld [vmem:[%s2829_s0 + $0x1a8] sm:$0xff] }
  0x2b   :  { %360 = vmatprep.subr.mxu1 %v359_v63  ;;  %3089 = vst [vmem:[#allocation43_spill] sm:$0xff] %v1963_v56  ;;  %3091 = vst [vmem:[#allocation44_spill] sm:$0xff] %v1977_v7  ;;  %v3092_v20 = vand.u32 4294901760, %v1938_v37  ;;  %153 = vmatpush2.msra.mxu0 %v1946_v53  ;;  %v1993_v12 = vsub.f32 %v1817_v2, %v1851_v58  ;;  %v2011_v2 = vld [vmem:[%s2829_s0 + $0x1a0] sm:$0xff] }
  0x2c   :  { %3088 = vst [vmem:[#allocation42_spill] sm:$0xff] %v1950_v1  ;;  %366 = vmatpush1.msra.mxu1 %v365_v54  ;;  %v371_v63 = vand.u32 4294901760, %v370_v32  ;;  %v3090_v54 = vand.u32 4294901760, %v1921_v50  ;;  %v383_v27 = vand.u32 4294901760, %v382_v43  ;;  %v3095_v43 = vand.u32 4294901760, %v1950_v1  ;;  %155 = vmatprep.subr.mxu0 %v1963_v56 }
  0x2d   :  { %v394_v62 = vsub.f32 %v1938_v37, %v3092_v20  ;;  %3094 = vst [vmem:[#allocation46_spill] sm:$0xff] %v1993_v12  ;;  %v2006_v37 = vand.u32 4294901760, %v1968_v51 }
  0x2e   :  { %v388_v32 = vsub.f32 %v1921_v50, %v3090_v54  ;;  %372 = vmatprep.subr.mxu1 %v371_v63  ;;  %v1989_v54 = vand.u32 4294901760, %v1955_v33  ;;  %v400_v20 = vsub.f32 %v1950_v1, %v3095_v43  ;;  %v2020_v43 = vand.u32 4294901760, %v1982_v14 }
  0x2f   :  { %378 = vmatpush1.msra.mxu1 %v377_v38  ;;  %3096 = vst [vmem:[#allocation47_spill] sm:$0xff] %v2006_v37  ;;  %v395_v58 = vand.u32 4294901760, %v394_v62  ;;  %v3099_v62 = vand.u32 4294901760, %v1977_v7  ;;  %v2036_v38 = vand.u32 4294901760, %v1998_v39 }
  0x30   :  { %3093 = vst [vmem:[#allocation45_spill] sm:$0xff] %v1989_v54  ;;  %v389_v63 = vand.u32 4294901760, %v388_v32  ;;  %384 = vmatprep.subr.mxu1 %v383_v27  ;;  %157 = vmatpush2.msra.mxu0 %v1989_v54  ;;  %v2017_v32 = vsub.f32 %v1830_v13, %v1868_v61  ;;  %3098 = vst [vmem:[#allocation49_spill] sm:$0xff] %v2020_v43  ;;  %v401_v1 = vand.u32 4294901760, %v400_v20  ;;  %v3102_v61 = vand.u32 4294901760, %v1993_v12 }
  0x31   :  { %v406_v27 = vsub.f32 %v1977_v7, %v3099_v62  ;;  %159 = vmatprep.subr.mxu0 %v2006_v37  ;;  %v2033_v13 = vsub.f32 %v1844_v41, %v1882_v19  ;;  %3101 = vst [vmem:[#allocation51_spill] sm:$0xff] %v2036_v38  ;;  %v2045_v20 = vsub.f32 %v1860_v36, %v1898_v57  ;;  %v2048_v62 = vand.u32 4294901760, %v2011_v2  ;;  %v2053_v41 = vld [vmem:[%s2829_s0 + $0x190] sm:$0xff]  ;;  %v2067_v57 = vld [vmem:[%s2829_s0 + $0x188] sm:$0xff] }
  0x32   :  { %3097 = vst [vmem:[#allocation48_spill] sm:$0xff] %v2017_v32  ;;  %390 = vmatpush1.msra.mxu1 %v389_v63  ;;  %v412_v50 = vsub.f32 %v1993_v12, %v3102_v61  ;;  %161 = vmatpush2.msra.mxu0 %v2020_v43  ;;  %v2059_v63 = vsub.f32 %v1873_v26, %v1910_v30  ;;  %v2062_v36 = vand.u32 4294901760, %v2025_v52  ;;  %v2119_v7 = vld [vmem:[%s2829_s0 + $0x170] sm:$0xff] }
  0x33   :  { %3100 = vst [vmem:[#allocation50_spill] sm:$0xff] %v2033_v13  ;;  %396 = vmatprep.subr.mxu1 %v395_v58  ;;  %3103 = vst [vmem:[#allocation52_spill] sm:$0xff] %v2045_v20  ;;  %v407_v58 = vand.u32 4294901760, %v406_v27  ;;  %163 = vmatprep.subr.mxu0 %v2036_v38  ;;  %v2932_v61 = vand.u32 4294901760, %v2045_v20  ;;  %v2076_v26 = vsub.f32 %v1887_v47, %v1924_v44  ;;  %v3109_v30 = vand.u32 4294901760, %v2033_v13  ;;  %v2093_v47 = vld [vmem:[%s2829_s0 + $0x180] sm:$0xff] }
  0x34   :  { %3104 = vst [vmem:[#allocation53_spill] sm:$0xff] %v2048_v62  ;;  %402 = vmatpush1.msra.mxu1 %v401_v1  ;;  %3105 = vst [vmem:[#allocation54_spill] sm:$0xff] %v2059_v63  ;;  %v413_v19 = vand.u32 4294901760, %v412_v50  ;;  %v3107_v1 = vand.u32 4294901760, %v2017_v32  ;;  %165 = vmatpush2.msra.mxu0 %v2048_v62  ;;  %v2084_v50 = vand.u32 4294901760, %v2053_v41  ;;  %v2100_v44 = vand.u32 4294901760, %v2067_v57 }
  0x35   :  { %3106 = vst [vmem:[#allocation55_spill] sm:$0xff] %v2062_v36  ;;  %3108 = vst [vmem:[#allocation56_spill] sm:$0xff] %v2076_v26  ;;  %408 = vmatprep.subr.mxu1 %v407_v58  ;;  %v424_v12 = vsub.f32 %v2033_v13, %v3109_v30  ;;  %167 = vmatprep.subr.mxu0 %v2062_v36  ;;  %v430_v30 = vsub.f32 %v2045_v20, %v2932_v61  ;;  %v3113_v13 = vand.u32 4294901760, %v2059_v63 }
  0x36   :  { %v418_v27 = vsub.f32 %v2017_v32, %v3107_v1  ;;  %3110 = vst [vmem:[#allocation57_spill] sm:$0xff] %v2084_v50  ;;  %v2088_v1 = vsub.f32 %v1915_v49, %v1946_v53  ;;  %414 = vmatpush1.msra.mxu1 %v413_v19  ;;  %3112 = vst [vmem:[#allocation59_spill] sm:$0xff] %v2100_v44  ;;  %v2105_v49 = vld [vmem:[%s2829_s0 + $0x178] sm:$0xff]  ;;  %169 = vmatpush2.msra.mxu0 %v2084_v50 }
  0x37   :  { %v425_v53 = vand.u32 4294901760, %v424_v12  ;;  %v436_v19 = vsub.f32 %v2059_v63, %v3113_v13  ;;  %v2114_v61 = vsub.f32 %v1929_v29, %v1963_v56  ;;  %v431_v20 = vand.u32 4294901760, %v430_v30  ;;  %171 = vmatprep.subr.mxu0 %v2100_v44  ;;  %v2161_v56 = vld [vmem:[%s2829_s0 + $0x158] sm:$0xff] }
  0x38   :  { %3111 = vst [vmem:[#allocation58_spill] sm:$0xff] %v2088_v1  ;;  %v419_v58 = vand.u32 4294901760, %v418_v27  ;;  %v3115_v12 = vand.u32 4294901760, %v2076_v26  ;;  %v2126_v13 = vand.u32 4294901760, %v2093_v47  ;;  %v2130_v29 = vsub.f32 %v1955_v33, %v1989_v54  ;;  %v2135_v27 = vld [vmem:[%s2829_s0 + $0x168] sm:$0xff]  ;;  %v2147_v33 = vld [vmem:[%s2829_s0 + $0x160] sm:$0xff] }
  0x39   :  { %3114 = vst [vmem:[#allocation60_spill] sm:$0xff] %v2114_v61  ;;  %v3118_v30 = vand.u32 4294901760, %v2088_v1 }
  0x3a   :  { %420 = vmatprep.subr.mxu1 %v419_v58  ;;  %v442_v32 = vsub.f32 %v2076_v26, %v3115_v12  ;;  %3116 = vst [vmem:[#allocation61_spill] sm:$0xff] %v2126_v13  ;;  %3117 = vst [vmem:[#allocation62_spill] sm:$0xff] %v2130_v29  ;;  %v437_v58 = vand.u32 4294901760, %v436_v19  ;;  %v2142_v26 = vand.u32 4294901760, %v2105_v49  ;;  %173 = vmatpush2.msra.mxu0 %v2126_v13 }
  0x3b   :  { %426 = vmatpush2.msra.mxu1 %v425_v53  ;;  %v448_v12 = vsub.f32 %v2088_v1, %v3118_v30  ;;  %v2153_v19 = vsub.f32 %v1968_v51, %v2006_v37  ;;  %v2156_v30 = vand.u32 4294901760, %v2119_v7  ;;  %v2169_v51 = vsub.f32 %v1982_v14, %v2020_v43  ;;  %v2189_v14 = vld [vmem:[%s2829_s0 + $0x150] sm:$0xff] }
  0x3c   :  { %3119 = vst [vmem:[#allocation63_spill] sm:$0xff] %v2142_v26  ;;  %432 = vmatprep.subr.mxu1 %v431_v20  ;;  %v443_v54 = vand.u32 4294901760, %v442_v32  ;;  %v3122_v32 = vand.u32 4294901760, %v2114_v61  ;;  %175 = vmatprep.subr.mxu0 %v2142_v26  ;;  %v2172_v53 = vand.u32 4294901760, %v2135_v27  ;;  %v3125_v37 = vand.u32 4294901760, %v2130_v29 }
  0x3d   :  { %3120 = vst [vmem:[#allocation64_spill] sm:$0xff] %v2153_v19  ;;  %3121 = vst [vmem:[#allocation65_spill] sm:$0xff] %v2156_v30  ;;  %438 = vmatpush2.msra.mxu1 %v437_v58  ;;  %v449_v1 = vand.u32 4294901760, %v448_v12  ;;  %177 = vmatpush2.msra.mxu0 %v2156_v30  ;;  %v2181_v12 = vsub.f32 %v1998_v39, %v2036_v38  ;;  %v2195_v58 = vsub.f32 %v2011_v2, %v2048_v62  ;;  %v2203_v38 = vld [vmem:[%s2829_s0 + $0x148] sm:$0xff] }
  0x3e   :  { %v454_v20 = vsub.f32 %v2114_v61, %v3122_v32  ;;  %3123 = vst [vmem:[#allocation66_spill] sm:$0xff] %v2169_v51  ;;  %3124 = vst [vmem:[#allocation67_spill] sm:$0xff] %v2172_v53  ;;  %444 = vmatprep.subr.mxu1 %v443_v54  ;;  %v460_v63 = vsub.f32 %v2130_v29, %v3125_v37  ;;  %v2184_v32 = vand.u32 4294901760, %v2147_v33  ;;  %179 = vmatprep.subr.mxu0 %v2172_v53  ;;  %v2255_v61 = vld [vmem:[%s2829_s0 + $0x130] sm:$0xff] }
  0x3f   :  { %3126 = vst [vmem:[#allocation68_spill] sm:$0xff] %v2181_v12  ;;  %450 = vmatpush2.msra.mxu1 %v449_v1  ;;  %3128 = vst [vmem:[#allocation70_spill] sm:$0xff] %v2195_v58  ;;  %v2198_v39 = vand.u32 4294901760, %v2161_v56  ;;  %v3130_v1 = vand.u32 4294901760, %v2153_v19  ;;  %v2965_v37 = vand.u32 4294901760, %v2181_v12  ;;  %v2212_v2 = vsub.f32 %v2025_v52, %v2062_v36  ;;  %v2229_v52 = vld [vmem:[%s2829_s0 + $0x140] sm:$0xff] }
  0x40   :  { %3127 = vst [vmem:[#allocation69_spill] sm:$0xff] %v2184_v32  ;;  %v455_v54 = vand.u32 4294901760, %v454_v20  ;;  %v461_v43 = vand.u32 4294901760, %v460_v63  ;;  %181 = vmatpush2.msra.mxu0 %v2184_v32  ;;  %v3132_v62 = vand.u32 4294901760, %v2169_v51  ;;  %v2220_v63 = vand.u32 4294901760, %v2189_v14 }
  0x41   :  { %3129 = vst [vmem:[#allocation71_spill] sm:$0xff] %v2198_v39  ;;  %v466_v20 = vsub.f32 %v2153_v19, %v3130_v1  ;;  %3131 = vst [vmem:[#allocation72_spill] sm:$0xff] %v2212_v2  ;;  %183 = vmatprep.subr.mxu0 %v2198_v39  ;;  %v2224_v1 = vsub.f32 %v2053_v41, %v2084_v50  ;;  %v2236_v36 = vand.u32 4294901760, %v2203_v38  ;;  %v2241_v41 = vld [vmem:[%s2829_s0 + $0x138] sm:$0xff] }
  0x42   :  { %456 = vmatprep.subr.mxu1 %v455_v54  ;;  %v472_v29 = vsub.f32 %v2169_v51, %v3132_v62  ;;  %3133 = vst [vmem:[#allocation73_spill] sm:$0xff] %v2220_v63  ;;  %v478_v62 = vsub.f32 %v2181_v12, %v2965_v37  ;;  %v3136_v51 = vand.u32 4294901760, %v2195_v58  ;;  %185 = vmatpush2.msra.mxu0 %v2220_v63 }
  0x43   :  { %3134 = vst [vmem:[#allocation74_spill] sm:$0xff] %v2224_v1  ;;  %462 = vmatpush2.msra.mxu1 %v461_v43  ;;  %v467_v54 = vand.u32 4294901760, %v466_v20  ;;  %3135 = vst [vmem:[#allocation75_spill] sm:$0xff] %v2236_v36  ;;  %v2250_v37 = vsub.f32 %v2067_v57, %v2100_v44  ;;  %187 = vmatprep.subr.mxu0 %v2236_v36  ;;  %v2266_v57 = vsub.f32 %v2093_v47, %v2126_v13  ;;  %v2271_v20 = vld [vmem:[%s2829_s0 + $0x128] sm:$0xff]  ;;  %v2283_v47 = vld [vmem:[%s2829_s0 + $0x120] sm:$0xff] }
  0x44   :  { %v473_v50 = vand.u32 4294901760, %v472_v29  ;;  %v484_v43 = vsub.f32 %v2195_v58, %v3136_v51  ;;  %v479_v12 = vand.u32 4294901760, %v478_v62  ;;  %v3138_v29 = vand.u32 4294901760, %v2212_v2  ;;  %v2297_v44 = vld [vmem:[%s2829_s0 + $0x118] sm:$0xff] }
  0x45   :  { %3137 = vst [vmem:[#allocation76_spill] sm:$0xff] %v2250_v37  ;;  %468 = vmatprep.subr.mxu1 %v467_v54  ;;  %v2262_v51 = vand.u32 4294901760, %v2229_v52  ;;  %3140 = vst [vmem:[#allocation78_spill] sm:$0xff] %v2266_v57  ;;  %v3141_v62 = vand.u32 4294901760, %v2224_v1 }
  0x46   :  { %v490_v19 = vsub.f32 %v2212_v2, %v3138_v29  ;;  %474 = vmatpush2.msra.mxu1 %v473_v50  ;;  %v485_v54 = vand.u32 4294901760, %v484_v43  ;;  %v2278_v2 = vand.u32 4294901760, %v2241_v41  ;;  %v2289_v43 = vsub.f32 %v2105_v49, %v2142_v26 }
  0x47   :  { %3139 = vst [vmem:[#allocation77_spill] sm:$0xff] %v2262_v51  ;;  %v496_v29 = vsub.f32 %v2224_v1, %v3141_v62  ;;  %480 = vmatprep.subr.mxu1 %v479_v12  ;;  %189 = vmatpush2.msra.mxu0 %v2262_v51  ;;  %v2292_v62 = vand.u32 4294901760, %v2255_v61  ;;  %v2305_v49 = vsub.f32 %v2119_v7, %v2156_v30  ;;  %v2308_v50 = vand.u32 4294901760, %v2271_v20  ;;  %v2325_v7 = vld [vmem:[%s2829_s0 + $0x110] sm:$0xff] }
  0x48   :  { %v491_v13 = vand.u32 4294901760, %v490_v19  ;;  %3142 = vst [vmem:[#allocation79_spill] sm:$0xff] %v2289_v43  ;;  %486 = vmatpush2.msra.mxu1 %v485_v54  ;;  %v3143_v19 = vand.u32 4294901760, %v2250_v37  ;;  %191 = vmatprep.subr.mxu0 %v2278_v2  ;;  %v3146_v26 = vand.u32 4294901760, %v2266_v57  ;;  %v2331_v54 = vsub.f32 %v2147_v33, %v2184_v32 }
  0x49   :  { %v497_v1 = vand.u32 4294901760, %v496_v29  ;;  %3144 = vst [vmem:[#allocation80_spill] sm:$0xff] %v2305_v49  ;;  %3145 = vst [vmem:[#allocation81_spill] sm:$0xff] %v2308_v50  ;;  %193 = vmatpush2.msra.mxu0 %v2292_v62  ;;  %v2317_v29 = vsub.f32 %v2135_v27, %v2172_v53  ;;  %v2334_v27 = vand.u32 4294901760, %v2297_v44  ;;  %v2339_v53 = vld [vmem:[%s2829_s0 + $0x108] sm:$0xff]  ;;  %v2348_v33 = vsub.f32 %v2161_v56, %v2198_v39  ;;  %v2365_v56 = vld [vmem:[%s2829_s0 + $0x100] sm:$0xff] }
  0x4a   :  { %v502_v12 = vsub.f32 %v2250_v37, %v3143_v19  ;;  %492 = vmatprep.subr.mxu1 %v491_v13  ;;  %v508_v58 = vsub.f32 %v2266_v57, %v3146_v26  ;;  %v2320_v19 = vand.u32 4294901760, %v2283_v47  ;;  %195 = vmatprep.subr.mxu0 %v2308_v50  ;;  %3149 = vst [vmem:[#allocation84_spill] sm:$0xff] %v2331_v54  ;;  %v3153_v32 = vand.u32 4294901760, %v2305_v49 }
  0x4b   :  { %3147 = vst [vmem:[#allocation82_spill] sm:$0xff] %v2317_v29  ;;  %498 = vmatpush2.msra.mxu1 %v497_v1  ;;  %3150 = vst [vmem:[#allocation85_spill] sm:$0xff] %v2334_v27  ;;  %v3151_v1 = vand.u32 4294901760, %v2289_v43  ;;  %v3000_v26 = vand.u32 4294901760, %v2317_v29  ;;  %v2372_v39 = vand.u32 4294901760, %v2339_v53 }
  0x4c   :  { %3148 = vst [vmem:[#allocation83_spill] sm:$0xff] %v2320_v19  ;;  %v503_v13 = vand.u32 4294901760, %v502_v12  ;;  %v509_v30 = vand.u32 4294901760, %v508_v58  ;;  %197 = vmatpush2.msra.mxu0 %v2320_v19  ;;  %3152 = vst [vmem:[#allocation86_spill] sm:$0xff] %v2348_v33  ;;  %v520_v57 = vsub.f32 %v2305_v49, %v3153_v32  ;;  %v2356_v58 = vand.u32 4294901760, %v2325_v7 }
  0x4d   :  { %v514_v12 = vsub.f32 %v2289_v43, %v3151_v1  ;;  %199 = vmatprep.subr.mxu0 %v2334_v27  ;;  %v2360_v1 = vsub.f32 %v2189_v14, %v2220_v63  ;;  %v526_v32 = vsub.f32 %v2317_v29, %v3000_v26  ;;  %v13_v14 = vld [vmem:[%s2830_s1 + $0x8] sm:$0xff]  ;;  %v3155_v49 = vand.u32 4294901760, %v2331_v54  ;;  %v12_v26 = vld [vmem:[%s2830_s1] sm:$0xff]  ;;  %s1402_s1 = smov [#allocation2]  }
  0x4e   :  { %504 = vmatprep.subr.mxu1 %v503_v13  ;;  %v521_v63 = vand.u32 4294901760, %v520_v57  ;;  %201 = vmatpush2.msra.mxu0 %v2356_v58  ;;  %v3157_v57 = vand.u32 4294901760, %v2348_v33  ;;  %s1371_s28 = sshll.u32 %s1402_s1, 4  ;;  %s1372_s28 = int_to_ptr.vmem [resolvable:$true] %s1371_s28 }
  0x4f   :  { %3154 = vst [vmem:[#allocation87_spill] sm:$0xff] %v2360_v1  ;;  %510 = vmatpush2.msra.mxu1 %v509_v30  ;;  %v515_v13 = vand.u32 4294901760, %v514_v12  ;;  %v532_v43 = vsub.f32 %v2331_v54, %v3155_v49  ;;  %v2384_v12 = vsub.f32 %v2203_v38, %v2236_v36  ;;  %v527_v37 = vand.u32 4294901760, %v526_v32  ;;  %203 = vmatprep.subr.mxu0 %v2372_v39  ;;  %s1380_s29 = scalar_lea.vmem %s1372_s28, 256  ;;  %p1385_p1 = scmp.lt.s32.totalorder %s1372_s28, %s1372_s28 }
  0x50   :  { %v538_v29 = vsub.f32 %v2348_v33, %v3157_v57  ;;  %v2394_v49 = vand.u32 4294901760, %v2365_v56  ;;  %v2398_v30 = vsub.f32 %v2229_v52, %v2262_v51  ;;  %v3159_v36 = vand.u32 4294901760, %v2360_v1  ;;  %p1381_p0 = scmp.ne.s32.totalorder %s1372_s28, %s1380_s29  ;;  %p1386_p2 = scmp.lt.s32.totalorder %s1380_s29, %s1380_s29 }
  0x51   :  { %3156 = vst [vmem:[#allocation88_spill] sm:$0xff] %v2384_v12  ;;  %516 = vmatprep.subr.mxu1 %v515_v13  ;;  %v533_v38 = vand.u32 4294901760, %v532_v43  ;;  %v3012_v32 = vand.u32 4294901760, %v2384_v12  ;;  %v2404_v54 = vand.u32 4294901760, %v13_v14  ;;  %v2410_v52 = vsub.f32 %v2241_v41, %v2278_v2 }
  0x52   :  { %3158 = vst [vmem:[#allocation89_spill] sm:$0xff] %v2398_v30  ;;  %522 = vmatpush2.msra.mxu1 %v521_v63  ;;  %v544_v13 = vsub.f32 %v2360_v1, %v3159_v36  ;;  %v539_v57 = vand.u32 4294901760, %v538_v29  ;;  %205 = vmatpush2.msra.mxu0 %v2394_v49  ;;  %v3011_v33 = vand.u32 4294901760, %v2398_v30  ;;  %v2412_v63 = vand.u32 4294901760, %v12_v26  ;;  %p1387_p3 = por %p1386_p2, %p1385_p1 }
  0x53   :  { %3160 = vst [vmem:[#allocation90_spill] sm:$0xff] %v2404_v54  ;;  %528 = vmatprep.subr.mxu1 %v527_v37  ;;  %3161 = vst [vmem:[#allocation91_spill] sm:$0xff] %v2410_v52  ;;  %v550_v36 = vsub.f32 %v2384_v12, %v3012_v32  ;;  %v2418_v51 = vsub.f32 %v13_v14, %v2404_v54  ;;  %618 = vmatprep.subr.mxu0 %v1465_v18  ;;  %v3015_v29 = vand.u32 4294901760, %v2410_v52 }
  0x54   :  { %3162 = vst [vmem:[#allocation92_spill] sm:$0xff] %v2412_v63  ;;  %534 = vmatpush2.msra.mxu1 %v533_v38  ;;  %v545_v43 = vand.u32 4294901760, %v544_v13  ;;  %v2423_v37 = vsub.f32 %v2255_v61, %v2292_v62  ;;  %v556_v41 = vsub.f32 %v2398_v30, %v3011_v33  ;;  %v2430_v38 = vsub.f32 %v12_v26, %v2412_v63  ;;  %p1388_p4 = pnand %p1387_p3, %p1381_p0 }
  0x55   :  { %540 = vmatprep.subr.mxu1 %v539_v57  ;;  %v2434_v14 = vsub.f32 %v2271_v20, %v2308_v50  ;;  %608 = vmatprep.mubr.f32.mxu1 %v2404_v54  ;;  %v551_v13 = vand.u32 4294901760, %v550_v36  ;;  %v3016_v61 = vand.u32 4294901760, %v2418_v51  ;;  %v2441_v33 = vsub.f32 %v2283_v47, %v2320_v19 }
  0x56   :  { %3163 = vst [vmem:[#allocation93_spill] sm:$0xff] %v2423_v37  ;;  %546 = vmatpush2.msra.mxu1 %v545_v43  ;;  %v3019_v57 = vand.u32 4294901760, %v2423_v37  ;;  %v557_v32 = vand.u32 4294901760, %v556_v41  ;;  %v562_v26 = vsub.f32 %v2410_v52, %v3015_v29  ;;  %v3024_v20 = vand.u32 4294901760, %v2430_v38 }
  0x57   :  { %3164 = vst [vmem:[#allocation94_spill] sm:$0xff] %v2434_v14  ;;  %v3025_v50 = vand.u32 4294901760, %v2434_v14  ;;  %552 = vmatprep.subr.mxu1 %v551_v13  ;;  %v209_v43 = vsub.f32 %v2418_v51, %v3016_v61  ;;  %v2457_v41 = vsub.f32 %v2297_v44, %v2334_v27  ;;  %v2467_v54 = vsub.f32 %v2325_v7, %v2356_v58 }
  0x58   :  { %v568_v36 = vsub.f32 %v2423_v37, %v3019_v57  ;;  %558 = vmatpush2.msra.mxu1 %v557_v32  ;;  %v563_v29 = vand.u32 4294901760, %v562_v26  ;;  %v215_v13 = vsub.f32 %v2430_v38, %v3024_v20  ;;  %v3167_v19 = vand.u32 4294901760, %v2441_v33 }
  0x59   :  { %3165 = vst [vmem:[#allocation95_spill] sm:$0xff] %v2457_v41  ;;  %v574_v61 = vsub.f32 %v2434_v14, %v3025_v50  ;;  %3166 = vst [vmem:[#allocation96_spill] sm:$0xff] %v2467_v54  ;;  %v210_v57 = vand.u32 4294901760, %v209_v43  ;;  %v3029_v32 = vand.u32 4294901760, %v2457_v41  ;;  %v3028_v20 = vand.u32 4294901760, %v2467_v54 }
  0x5a   :  { %v569_v47 = vand.u32 4294901760, %v568_v36  ;;  %v580_v44 = vsub.f32 %v2441_v33, %v3167_v19  ;;  %564 = vmatprep.subr.mxu1 %v563_v29  ;;  %v216_v26 = vand.u32 4294901760, %v215_v13  ;;  %v2476_v50 = vsub.f32 %v2339_v53, %v2372_v39 }
  0x5b   :  { %v575_v27 = vand.u32 4294901760, %v574_v61  ;;  %211 = vmatprep.mubr.f32.mxu0 %v210_v57  ;;  %v586_v43 = vsub.f32 %v2457_v41, %v3029_v32  ;;  %v2483_v19 = vsub.f32 %v2365_v56, %v2394_v49  ;;  %v592_v29 = vsub.f32 %v2467_v54, %v3028_v20  ;;  %v3183_v20 = vld [vmem:[#allocation11_spill] sm:$0xff]  ;;  %v3184_v32 = vld [vmem:[#allocation36_spill] sm:$0xff] }
  0x5c   :  { %3168 = vst [vmem:[#allocation97_spill] sm:$0xff] %v2476_v50  ;;  %570 = vmatpush2.msra.mxu1 %v569_v47  ;;  %v581_v7 = vand.u32 4294901760, %v580_v44  ;;  %217 = vmatmul.mubr.f32.vlgmr.msra.gmra.mxu0 %v216_v26  ;;  %v3027_v53 = vand.u32 4294901760, %v2476_v50  ;;  %v3170_v44 = vld [vmem:[#allocation22_spill] sm:$0xff]  ;;  %v3171_v26 = vld [vmem:[#allocation5_spill] sm:$0xff] }
  0x5d   :  { %3169 = vst [vmem:[#allocation98_spill] sm:$0xff] %v2483_v19  ;;  %576 = vmatprep.subr.mxu1 %v575_v27  ;;  %621 = vmatpush1.msra.mxu0 %v1487_v23  ;;  %v587_v61 = vand.u32 4294901760, %v586_v43  ;;  %v3026_v57 = vand.u32 4294901760, %v2483_v19  ;;  %v593_v36 = vand.u32 4294901760, %v592_v29  ;;  %v3173_v43 = vld [vmem:[#allocation6_spill] sm:$0xff] }
  0x5e   :  { %582 = vmatpush2.msra.mxu1 %v581_v7  ;;  %624 = vmatprep.subr.mxu0 %v1493_v25  ;;  %v598_v56 = vsub.f32 %v2476_v50, %v3027_v53  ;;  %v3172_v7 = vld [vmem:[#allocation24_spill] sm:$0xff]  ;;  %v3174_v29 = vld [vmem:[#allocation26_spill] sm:$0xff] }
  0x5f   :  { %810 = vmatprep.mubr.f32.mxu0 %v2418_v51  ;;  %627 = vmatpush1.msra.mxu0 %v1516_v31  ;;  %v604_v27 = vsub.f32 %v2483_v19, %v3026_v57  ;;  %v3181_v57 = vld [vmem:[#allocation10_spill] sm:$0xff] }
  0x60   :  { %588 = vmatprep.subr.mxu1 %v587_v61  ;;  %630 = vmatprep.subr.mxu0 %v1525_v35  ;;  %v599_v47 = vand.u32 4294901760, %v598_v56  ;;  %v3175_v61 = vld [vmem:[#allocation7_spill] sm:$0xff]  ;;  %v3177_v56 = vld [vmem:[#allocation8_spill] sm:$0xff]  ;;  %v3182_v53 = vld [vmem:[#allocation34_spill] sm:$0xff] }
  0x61   :  { %594 = vmatpush2.msra.mxu1 %v593_v36  ;;  %633 = vmatpush1.msra.mxu0 %v1541_v40  ;;  %v605_v13 = vand.u32 4294901760, %v604_v27  ;;  %v3176_v36 = vld [vmem:[#allocation28_spill] sm:$0xff]  ;;  %v3178_v27 = vld [vmem:[#allocation30_spill] sm:$0xff] }
  0x62   :  { %600 = vmatprep.subr.mxu1 %v599_v47  ;;  %636 = vmatprep.subr.mxu0 %v1555_v45  ;;  %v3179_v47 = vld [vmem:[#allocation9_spill] sm:$0xff] }
  0x63   :  { %606 = vmatpush2.msra.mxu1 %v605_v13  ;;  %639 = vmatpush1.msra.mxu0 %v1590_v59  ;;  %v3180_v13 = vld [vmem:[#allocation32_spill] sm:$0xff] }
  0x64   :  { %610 = vmatmul.mubr.f32.vlgmr.msra.gmra.mxu1 %v2412_v63  ;;  %642 = vmatprep.subr.mxu0 %v1605_v0  ;;  %v3185_v63 = vld [vmem:[#allocation12_spill] sm:$0xff] }
  0x65   :  { %820 = vmatprep.subr.mxu1 %v1427_v3  ;;  %645 = vmatpush1.msra.mxu0 %v1619_v8 }
  0x66   :  { %822 = vmatpush1.msra.mxu1 %v1429_v4  ;;  %648 = vmatprep.subr.mxu0 %v1633_v42 }
  0x67   :  { %824 = vmatprep.subr.mxu1 %v1431_v5  ;;  %651 = vmatpush1.msra.mxu0 %v1645_v48 }
  0x68   :  { %826 = vmatpush1.msra.mxu1 %v1442_v9  ;;  %654 = vmatprep.subr.mxu0 %v1662_v21 }
  0x69   :  { %828 = vmatprep.subr.mxu1 %v1444_v10  ;;  %657 = vmatpush1.msra.mxu0 %v1674_v6 }
  0x6a   :  { %830 = vmatpush1.msra.mxu1 %v1446_v11  ;;  %660 = vmatprep.subr.mxu0 %v1701_v55 }
  0x6b   :  { %832 = vmatprep.subr.mxu1 %v1458_v15  ;;  %663 = vmatpush1.msra.mxu0 %v1717_v28 }
  0x6c   :  { %834 = vmatpush1.msra.mxu1 %v1460_v16  ;;  %666 = vmatprep.subr.mxu0 %v1741_v34 }
  0x6d   :  { %836 = vmatprep.subr.mxu1 %v1462_v17  ;;  %669 = vmatpush1.msra.mxu0 %v1757_v46 }
  0x6e   :  { %838 = vmatpush1.msra.mxu1 %v1484_v22  ;;  %672 = vmatprep.subr.mxu0 %v1769_v60 }
  0x6f   :  { %840 = vmatprep.subr.mxu1 %v1490_v24  ;;  %675 = vmatpush1.msra.mxu0 %v3170_v44 }
  0x70   :  { %842 = vmatpush1.msra.mxu1 %v3171_v26  ;;  %678 = vmatprep.subr.mxu0 %v3172_v7 }
  0x71   :  { %844 = vmatprep.subr.mxu1 %v3173_v43  ;;  %681 = vmatpush1.msra.mxu0 %v3174_v29 }
  0x72   :  { %846 = vmatpush1.msra.mxu1 %v3175_v61  ;;  %684 = vmatprep.subr.mxu0 %v3176_v36  ;;  %v3186_v61 = vld [vmem:[#allocation38_spill] sm:$0xff]  ;;  %v3187_v36 = vld [vmem:[#allocation13_spill] sm:$0xff] }
  0x73   :  { %848 = vmatprep.subr.mxu1 %v3177_v56  ;;  %687 = vmatpush1.msra.mxu0 %v3178_v27  ;;  %v3188_v56 = vld [vmem:[#allocation40_spill] sm:$0xff]  ;;  %v3189_v27 = vld [vmem:[#allocation14_spill] sm:$0xff] }
  0x74   :  { %850 = vmatpush1.msra.mxu1 %v3179_v47  ;;  %690 = vmatprep.subr.mxu0 %v3180_v13  ;;  %v3190_v47 = vld [vmem:[#allocation42_spill] sm:$0xff]  ;;  %v3191_v13 = vld [vmem:[#allocation15_spill] sm:$0xff] }
  0x75   :  { %852 = vmatprep.subr.mxu1 %v3181_v57  ;;  %693 = vmatpush1.msra.mxu0 %v3182_v53  ;;  %v3192_v57 = vld [vmem:[#allocation44_spill] sm:$0xff] }
  0x76   :  { %854 = vmatpush1.msra.mxu1 %v3183_v20  ;;  %696 = vmatprep.subr.mxu0 %v3184_v32  ;;  %v3193_v53 = vld [vmem:[#allocation16_spill] sm:$0xff]  ;;  %v3194_v20 = vld [vmem:[#allocation46_spill] sm:$0xff]  ;;  %v3195_v32 = vld [vmem:[#allocation17_spill] sm:$0xff] }
  0x77   :  { %856 = vmatprep.subr.mxu1 %v3185_v63  ;;  %699 = vmatpush1.msra.mxu0 %v3186_v61  ;;  %v3196_v63 = vld [vmem:[#allocation48_spill] sm:$0xff]  ;;  %v3197_v61 = vld [vmem:[#allocation18_spill] sm:$0xff] }
  0x78   :  { %858 = vmatpush1.msra.mxu1 %v3187_v36  ;;  %702 = vmatprep.subr.mxu0 %v3188_v56  ;;  %v3198_v36 = vld [vmem:[#allocation50_spill] sm:$0xff]  ;;  %v3199_v56 = vld [vmem:[#allocation19_spill] sm:$0xff] }
  0x79   :  { %860 = vmatprep.subr.mxu1 %v3189_v27  ;;  %705 = vmatpush1.msra.mxu0 %v3190_v47  ;;  %v3200_v27 = vld [vmem:[#allocation52_spill] sm:$0xff] }
  0x7a   :  { %862 = vmatpush1.msra.mxu1 %v3191_v13  ;;  %708 = vmatprep.subr.mxu0 %v3192_v57  ;;  %v3201_v47 = vld [vmem:[#allocation20_spill] sm:$0xff]  ;;  %v3202_v13 = vld [vmem:[#allocation54_spill] sm:$0xff]  ;;  %v3203_v57 = vld [vmem:[#allocation21_spill] sm:$0xff] }
  0x7b   :  { %864 = vmatprep.subr.mxu1 %v3193_v53  ;;  %711 = vmatpush1.msra.mxu0 %v3194_v20  ;;  %v3204_v53 = vld [vmem:[#allocation56_spill] sm:$0xff]  ;;  %v3205_v20 = vld [vmem:[#allocation23_spill] sm:$0xff] }
  0x7c   :  { %866 = vmatpush1.msra.mxu1 %v3195_v32  ;;  %714 = vmatprep.subr.mxu0 %v3196_v63  ;;  %v3206_v32 = vld [vmem:[#allocation58_spill] sm:$0xff]  ;;  %v3207_v63 = vld [vmem:[#allocation25_spill] sm:$0xff] }
  0x7d   :  { %868 = vmatprep.subr.mxu1 %v3197_v61  ;;  %717 = vmatpush2.msra.mxu0 %v3198_v36  ;;  %v3208_v61 = vld [vmem:[#allocation60_spill] sm:$0xff]  ;;  %v3209_v36 = vld [vmem:[#allocation27_spill] sm:$0xff] }
  0x7e   :  { %870 = vmatpush1.msra.mxu1 %v3199_v56  ;;  %720 = vmatprep.subr.mxu0 %v3200_v27  ;;  %v3210_v56 = vld [vmem:[#allocation62_spill] sm:$0xff]  ;;  %v3211_v27 = vld [vmem:[#allocation29_spill] sm:$0xff] }
  0x7f   :  { %872 = vmatprep.subr.mxu1 %v3201_v47  ;;  %723 = vmatpush2.msra.mxu0 %v3202_v13  ;;  %v3212_v47 = vld [vmem:[#allocation64_spill] sm:$0xff]  ;;  %v3213_v13 = vld [vmem:[#allocation31_spill] sm:$0xff] }
  0x80   :  { %874 = vmatpush1.msra.mxu1 %v3203_v57  ;;  %726 = vmatprep.subr.mxu0 %v3204_v53  ;;  %v3214_v57 = vld [vmem:[#allocation66_spill] sm:$0xff]  ;;  %v3215_v53 = vld [vmem:[#allocation33_spill] sm:$0xff] }
  0x81   :  { %876 = vmatprep.subr.mxu1 %v3205_v20  ;;  %729 = vmatpush2.msra.mxu0 %v3206_v32  ;;  %v3216_v20 = vld [vmem:[#allocation68_spill] sm:$0xff]  ;;  %v3217_v32 = vld [vmem:[#allocation35_spill] sm:$0xff] }
  0x82   :  { %878 = vmatpush1.msra.mxu1 %v3207_v63  ;;  %732 = vmatprep.subr.mxu0 %v3208_v61  ;;  %v3218_v63 = vld [vmem:[#allocation70_spill] sm:$0xff]  ;;  %v3219_v61 = vld [vmem:[#allocation37_spill] sm:$0xff] }
  0x83   :  { %880 = vmatprep.subr.mxu1 %v3209_v36  ;;  %735 = vmatpush2.msra.mxu0 %v3210_v56  ;;  %v3220_v36 = vld [vmem:[#allocation72_spill] sm:$0xff]  ;;  %v3221_v56 = vld [vmem:[#allocation39_spill] sm:$0xff] }
  0x84   :  { %882 = vmatpush1.msra.mxu1 %v3211_v27  ;;  %738 = vmatprep.subr.mxu0 %v3212_v47  ;;  %v3222_v27 = vld [vmem:[#allocation74_spill] sm:$0xff]  ;;  %v3223_v47 = vld [vmem:[#allocation41_spill] sm:$0xff] }
  0x85   :  { %884 = vmatprep.subr.mxu1 %v3213_v13  ;;  %741 = vmatpush2.msra.mxu0 %v3214_v57  ;;  %v3224_v13 = vld [vmem:[#allocation76_spill] sm:$0xff]  ;;  %v3225_v57 = vld [vmem:[#allocation43_spill] sm:$0xff] }
  0x86   :  { %886 = vmatpush2.msra.mxu1 %v3215_v53  ;;  %744 = vmatprep.subr.mxu0 %v3216_v20  ;;  %v3226_v53 = vld [vmem:[#allocation78_spill] sm:$0xff]  ;;  %v3227_v20 = vld [vmem:[#allocation45_spill] sm:$0xff] }
  0x87   :  { %888 = vmatprep.subr.mxu1 %v3217_v32  ;;  %747 = vmatpush2.msra.mxu0 %v3218_v63  ;;  %v3228_v32 = vld [vmem:[#allocation79_spill] sm:$0xff] }
  0x88   :  { %890 = vmatpush2.msra.mxu1 %v3219_v61  ;;  %750 = vmatprep.subr.mxu0 %v3220_v36  ;;  %v3229_v63 = vld [vmem:[#allocation47_spill] sm:$0xff]  ;;  %v3230_v61 = vld [vmem:[#allocation80_spill] sm:$0xff]  ;;  %v3231_v36 = vld [vmem:[#allocation49_spill] sm:$0xff] }
  0x89   :  { %892 = vmatprep.subr.mxu1 %v3221_v56  ;;  %753 = vmatpush2.msra.mxu0 %v3222_v27  ;;  %v3232_v56 = vld [vmem:[#allocation82_spill] sm:$0xff]  ;;  %v3233_v27 = vld [vmem:[#allocation51_spill] sm:$0xff] }
  0x8a   :  { %894 = vmatpush2.msra.mxu1 %v3223_v47  ;;  %756 = vmatprep.subr.mxu0 %v3224_v13  ;;  %v3234_v47 = vld [vmem:[#allocation84_spill] sm:$0xff]  ;;  %v3235_v13 = vld [vmem:[#allocation53_spill] sm:$0xff] }
  0x8b   :  { %896 = vmatprep.subr.mxu1 %v3225_v57  ;;  %759 = vmatpush2.msra.mxu0 %v3226_v53  ;;  %v3236_v57 = vld [vmem:[#allocation86_spill] sm:$0xff]  ;;  %v3237_v53 = vld [vmem:[#allocation55_spill] sm:$0xff] }
  0x8c   :  { %898 = vmatpush2.msra.mxu1 %v3227_v20  ;;  %762 = vmatprep.subr.mxu0 %v3228_v32  ;;  %v3238_v32 = vld [vmem:[#allocation57_spill] sm:$0xff] }
  0x8d   :  { %900 = vmatprep.subr.mxu1 %v3229_v63  ;;  %765 = vmatpush2.msra.mxu0 %v3230_v61  ;;  %v3239_v61 = vld [vmem:[#allocation59_spill] sm:$0xff] }
  0x8e   :  { %902 = vmatpush2.msra.mxu1 %v3231_v36  ;;  %768 = vmatprep.subr.mxu0 %v3232_v56  ;;  %v3240_v56 = vld [vmem:[#allocation61_spill] sm:$0xff] }
  0x8f   :  { %904 = vmatprep.subr.mxu1 %v3233_v27  ;;  %771 = vmatpush2.msra.mxu0 %v3234_v47  ;;  %v3241_v47 = vld [vmem:[#allocation63_spill] sm:$0xff] }
  0x90   :  { %906 = vmatpush2.msra.mxu1 %v3235_v13  ;;  %774 = vmatprep.subr.mxu0 %v3236_v57  ;;  %v3242_v57 = vld [vmem:[#allocation65_spill] sm:$0xff] }
  0x91   :  { %908 = vmatprep.subr.mxu1 %v3237_v53  ;;  %777 = vmatpush2.msra.mxu0 %v2360_v1  ;;  %v3243_v1 = vld [vmem:[#allocation67_spill] sm:$0xff] }
  0x92   :  { %910 = vmatpush2.msra.mxu1 %v3238_v32  ;;  %780 = vmatprep.subr.mxu0 %v2384_v12  ;;  %v3244_v12 = vld [vmem:[#allocation69_spill] sm:$0xff] }
  0x93   :  { %912 = vmatprep.subr.mxu1 %v3239_v61  ;;  %783 = vmatpush2.msra.mxu0 %v2398_v30  ;;  %v3245_v30 = vld [vmem:[#allocation71_spill] sm:$0xff] }
  0x94   :  { %914 = vmatpush2.msra.mxu1 %v3240_v56  ;;  %786 = vmatprep.subr.mxu0 %v2410_v52  ;;  %v3246_v52 = vld [vmem:[#allocation73_spill] sm:$0xff] }
  0x95   :  { %916 = vmatprep.subr.mxu1 %v3241_v47  ;;  %789 = vmatpush2.msra.mxu0 %v2423_v37  ;;  %v3247_v37 = vld [vmem:[#allocation75_spill] sm:$0xff] }
  0x96   :  { %918 = vmatpush2.msra.mxu1 %v3242_v57  ;;  %792 = vmatprep.subr.mxu0 %v2434_v14  ;;  %v3248_v14 = vld [vmem:[#allocation77_spill] sm:$0xff] }
  0x97   :  { %920 = vmatprep.subr.mxu1 %v3243_v1  ;;  %795 = vmatpush2.msra.mxu0 %v2441_v33 }
  0x98   :  { %922 = vmatpush2.msra.mxu1 %v3244_v12  ;;  %798 = vmatprep.subr.mxu0 %v2457_v41  ;;  %v3249_v41 = vand.u32 4294901760, %v1465_v18  ;;  %v3256_v18 = vand.u32 4294901760, %v1525_v35  ;;  %v3261_v35 = vand.u32 4294901760, %v2430_v38 }
  0x99   :  { %924 = vmatprep.subr.mxu1 %v3245_v30  ;;  %801 = vmatpush2.msra.mxu0 %v2467_v54  ;;  %v3250_v54 = vand.u32 4294901760, %v1487_v23  ;;  %v3257_v23 = vand.u32 4294901760, %v1541_v40  ;;  %v3263_v40 = vand.u32 4294901760, %v1619_v8 }
  0x9a   :  { %926 = vmatpush2.msra.mxu1 %v3246_v52  ;;  %804 = vmatprep.subr.mxu0 %v2476_v50  ;;  %v3251_v52 = vld [vmem:[#allocation81_spill] sm:$0xff] }
  0x9b   :  { %928 = vmatprep.subr.mxu1 %v3247_v37  ;;  %807 = vmatpush2.msra.mxu0 %v2483_v19  ;;  %v3252_v37 = vand.u32 4294901760, %v1493_v25  ;;  %v3253_v19 = vld [vmem:[#allocation83_spill] sm:$0xff]  ;;  %v3255_v50 = vld [vmem:[#allocation85_spill] sm:$0xff]  ;;  %v3258_v25 = vand.u32 4294901760, %v1555_v45  ;;  %v3264_v45 = vand.u32 4294901760, %v1633_v42 }
  0x9c   :  { %930 = vmatpush2.msra.mxu1 %v3248_v14  ;;  %813 = vmatmul.mubr.f32.vlgmr.msra.gmra.mxu0 %v2430_v38  ;;  %v3254_v14 = vand.u32 4294901760, %v1516_v31  ;;  %v3259_v31 = vand.u32 4294901760, %v2418_v51  ;;  %v3282_v42 = vld [vmem:[#allocation9_spill] sm:$0xff]  ;;  %v3288_v51 = vld [vmem:[#allocation11_spill] sm:$0xff]  ;;  %v3289_v38 = vld [vmem:[#allocation36_spill] sm:$0xff] }
  0x9d   :  { %932 = vmatprep.subr.mxu1 %v2278_v2  ;;  %963 = vmatprep.subr.mxu0 %v3249_v41  ;;  %v3291_v41 = vld [vmem:[#allocation12_spill] sm:$0xff] }
  0x9e   :  { %934 = vmatpush2.msra.mxu1 %v2292_v62  ;;  %967 = vmatpush1.msra.mxu0 %v3250_v54  ;;  %v3260_v54 = vand.u32 4294901760, %v1590_v59  ;;  %v3265_v59 = vand.u32 4294901760, %v1645_v48  ;;  %v3283_v48 = vld [vmem:[#allocation32_spill] sm:$0xff] }
  0x9f   :  { %936 = vmatprep.subr.mxu1 %v3251_v52  ;;  %971 = vmatprep.subr.mxu0 %v3252_v37  ;;  %v3262_v37 = vand.u32 4294901760, %v1605_v0  ;;  %v3266_v0 = vand.u32 4294901760, %v1662_v21  ;;  %v3284_v21 = vand.u32 4294901760, %v3283_v48  ;;  %v3324_v48 = vld [vmem:[#allocation25_spill] sm:$0xff] }
  0xa0   :  { %938 = vmatpush2.msra.mxu1 %v3253_v19  ;;  %975 = vmatpush1.msra.mxu0 %v3254_v14  ;;  %v3290_v14 = vand.u32 4294901760, %v3289_v38  ;;  %v3330_v38 = vld [vmem:[#allocation29_spill] sm:$0xff] }
  0xa1   :  { %940 = vmatprep.subr.mxu1 %v3255_v50  ;;  %979 = vmatprep.subr.mxu0 %v3256_v18  ;;  %v3297_v18 = vld [vmem:[#allocation14_spill] sm:$0xff] }
  0xa2   :  { %942 = vmatpush2.msra.mxu1 %v2356_v58  ;;  %983 = vmatpush1.msra.mxu0 %v3257_v23  ;;  %v3298_v23 = vld [vmem:[#allocation42_spill] sm:$0xff] }
  0xa3   :  { %944 = vmatprep.subr.mxu1 %v2372_v39  ;;  %987 = vmatprep.subr.mxu0 %v3258_v25  ;;  %v3299_v25 = vand.u32 4294901760, %v3298_v23  ;;  %v3339_v23 = vld [vmem:[#allocation35_spill] sm:$0xff] }
  0xa4   :  { %946 = vmatpush2.msra.mxu1 %v2394_v49  ;;  %950 = vmatprep.mubr.f32.mxu1 %v3259_v31  ;;  %v3300_v31 = vld [vmem:[#allocation15_spill] sm:$0xff] }
  0xa5   :  { %991 = vmatpush1.msra.mxu0 %v3260_v54  ;;  %954 = vmatmul.mubr.f32.vlgmr.msra.gmra.mxu1 %v3261_v35  ;;  %v3301_v54 = vld [vmem:[#allocation44_spill] sm:$0xff] }
  0xa6   :  { %995 = vmatprep.subr.mxu0 %v3262_v37  ;;  %1226 = vmatprep.subr.mxu1 %v1427_v3  ;;  %v3267_v3 = vand.u32 4294901760, %v1674_v6  ;;  %v3285_v6 = vld [vmem:[#allocation10_spill] sm:$0xff]  ;;  %v3302_v35 = vand.u32 4294901760, %v3301_v54  ;;  %v3303_v37 = vld [vmem:[#allocation16_spill] sm:$0xff]  ;;  %v3342_v54 = vld [vmem:[#allocation37_spill] sm:$0xff] }
  0xa7   :  { %999 = vmatpush1.msra.mxu0 %v3263_v40  ;;  %1228 = vmatpush1.msra.mxu1 %v1429_v4  ;;  %v3268_v4 = vand.u32 4294901760, %v1701_v55  ;;  %v3304_v40 = vld [vmem:[#allocation46_spill] sm:$0xff] }
  0xa8   :  { %1003 = vmatprep.subr.mxu0 %v3264_v45  ;;  %1230 = vmatprep.subr.mxu1 %v1431_v5  ;;  %v3269_v5 = vand.u32 4294901760, %v1717_v28  ;;  %v3286_v28 = vld [vmem:[#allocation34_spill] sm:$0xff]  ;;  %v3305_v45 = vand.u32 4294901760, %v3304_v40  ;;  %v3345_v40 = vld [vmem:[#allocation39_spill] sm:$0xff] }
  0xa9   :  { %1007 = vmatpush1.msra.mxu0 %v3265_v59  ;;  %1232 = vmatpush1.msra.mxu1 %v1442_v9  ;;  %v3270_v9 = vand.u32 4294901760, %v1741_v34  ;;  %v3276_v34 = vld [vmem:[#allocation7_spill] sm:$0xff]  ;;  %v3306_v59 = vld [vmem:[#allocation17_spill] sm:$0xff] }
  0xaa   :  { %1011 = vmatprep.subr.mxu0 %v3266_v0  ;;  %1234 = vmatprep.subr.mxu1 %v1444_v10  ;;  %v3271_v10 = vand.u32 4294901760, %v1757_v46  ;;  %v3287_v46 = vand.u32 4294901760, %v3286_v28  ;;  %v3307_v0 = vld [vmem:[#allocation48_spill] sm:$0xff]  ;;  %v3327_v28 = vld [vmem:[#allocation27_spill] sm:$0xff] }
  0xab   :  { %1015 = vmatpush1.msra.mxu0 %v3267_v3  ;;  %1236 = vmatpush1.msra.mxu1 %v1446_v11  ;;  %v3272_v11 = vand.u32 4294901760, %v1769_v60  ;;  %v3279_v60 = vld [vmem:[#allocation8_spill] sm:$0xff]  ;;  %v3308_v3 = vand.u32 4294901760, %v3307_v0  ;;  %v3348_v0 = vld [vmem:[#allocation41_spill] sm:$0xff] }
  0xac   :  { %1019 = vmatprep.subr.mxu0 %v3268_v4  ;;  %1238 = vmatprep.subr.mxu1 %v1458_v15  ;;  %v3273_v15 = vand.u32 4294901760, %v3170_v44  ;;  %v3292_v44 = vld [vmem:[#allocation38_spill] sm:$0xff] }
  0xad   :  { %1023 = vmatpush1.msra.mxu0 %v3269_v5  ;;  %1240 = vmatpush1.msra.mxu1 %v1460_v16  ;;  %v3274_v16 = vand.u32 4294901760, %v3172_v7  ;;  %v3294_v7 = vld [vmem:[#allocation13_spill] sm:$0xff]  ;;  %v3309_v4 = vld [vmem:[#allocation18_spill] sm:$0xff] }
  0xae   :  { %1027 = vmatprep.subr.mxu0 %v3270_v9  ;;  %1242 = vmatprep.subr.mxu1 %v1462_v17  ;;  %v3275_v17 = vand.u32 4294901760, %v3174_v29  ;;  %v3310_v5 = vld [vmem:[#allocation50_spill] sm:$0xff] }
  0xaf   :  { %1031 = vmatpush1.msra.mxu0 %v3271_v10  ;;  %1244 = vmatpush1.msra.mxu1 %v1484_v22  ;;  %v3277_v22 = vld [vmem:[#allocation28_spill] sm:$0xff]  ;;  %v3311_v9 = vand.u32 4294901760, %v3310_v5  ;;  %v3312_v10 = vld [vmem:[#allocation19_spill] sm:$0xff] }
  0xb0   :  { %1035 = vmatprep.subr.mxu0 %v3272_v11  ;;  %1246 = vmatprep.subr.mxu1 %v1490_v24  ;;  %v3278_v55 = vand.u32 4294901760, %v3277_v22  ;;  %v3280_v24 = vld [vmem:[#allocation30_spill] sm:$0xff]  ;;  %v3313_v11 = vld [vmem:[#allocation52_spill] sm:$0xff]  ;;  %v3318_v22 = vld [vmem:[#allocation21_spill] sm:$0xff] }
  0xb1   :  { %1039 = vmatpush1.msra.mxu0 %v3273_v15  ;;  %1248 = vmatpush1.msra.mxu1 %v3171_v26  ;;  %v3281_v8 = vand.u32 4294901760, %v3280_v24  ;;  %v3293_v26 = vand.u32 4294901760, %v3292_v44  ;;  %v3314_v15 = vand.u32 4294901760, %v3313_v11  ;;  %v3321_v24 = vld [vmem:[#allocation23_spill] sm:$0xff] }
  0xb2   :  { %1043 = vmatprep.subr.mxu0 %v3274_v16  ;;  %1250 = vmatprep.subr.mxu1 %v3173_v43  ;;  %v3295_v43 = vld [vmem:[#allocation40_spill] sm:$0xff]  ;;  %v3333_v44 = vld [vmem:[#allocation31_spill] sm:$0xff] }
  0xb3   :  { %1047 = vmatpush1.msra.mxu0 %v3275_v17  ;;  %1252 = vmatpush1.msra.mxu1 %v3276_v34  ;;  %v3296_v29 = vand.u32 4294901760, %v3295_v43  ;;  %v3315_v16 = vld [vmem:[#allocation20_spill] sm:$0xff]  ;;  %v3316_v17 = vld [vmem:[#allocation54_spill] sm:$0xff]  ;;  %v3336_v43 = vld [vmem:[#allocation33_spill] sm:$0xff] }
  0xb4   :  { %1051 = vmatprep.subr.mxu0 %v3278_v55  ;;  %1254 = vmatprep.subr.mxu1 %v3279_v60  ;;  %v3317_v34 = vand.u32 4294901760, %v3316_v17  ;;  %v3319_v55 = vld [vmem:[#allocation56_spill] sm:$0xff]  ;;  %v3351_v5 = vld [vmem:[#allocation43_spill] sm:$0xff] }
  0xb5   :  { %1055 = vmatpush1.msra.mxu0 %v3281_v8  ;;  %1256 = vmatpush1.msra.mxu1 %v3282_v42  ;;  %v3320_v60 = vand.u32 4294901760, %v3319_v55  ;;  %v3322_v8 = vld [vmem:[#allocation58_spill] sm:$0xff]  ;;  %v3354_v11 = vld [vmem:[#allocation79_spill] sm:$0xff]  ;;  %v3360_v55 = vld [vmem:[#allocation84_spill] sm:$0xff] }
  0xb6   :  { %1059 = vmatprep.subr.mxu0 %v3284_v21  ;;  %1258 = vmatprep.subr.mxu1 %v3285_v6  ;;  %v3323_v42 = vand.u32 4294901760, %v3322_v8  ;;  %v3325_v21 = vld [vmem:[#allocation60_spill] sm:$0xff] }
  0xb7   :  { %1063 = vmatpush1.msra.mxu0 %v3287_v46  ;;  %1260 = vmatpush1.msra.mxu1 %v3288_v51  ;;  %v3326_v6 = vand.u32 4294901760, %v3325_v21  ;;  %v3328_v46 = vld [vmem:[#allocation62_spill] sm:$0xff] }
  0xb8   :  { %1067 = vmatprep.subr.mxu0 %v3290_v14  ;;  %1262 = vmatprep.subr.mxu1 %v3291_v41  ;;  %v3329_v51 = vand.u32 4294901760, %v3328_v46  ;;  %v3331_v14 = vld [vmem:[#allocation64_spill] sm:$0xff] }
  0xb9   :  { %1071 = vmatpush1.msra.mxu0 %v3293_v26  ;;  %1264 = vmatpush1.msra.mxu1 %v3294_v7  ;;  %v3332_v41 = vand.u32 4294901760, %v3331_v14  ;;  %v3334_v26 = vld [vmem:[#allocation66_spill] sm:$0xff] }
  0xba   :  { %1075 = vmatprep.subr.mxu0 %v3296_v29  ;;  %1266 = vmatprep.subr.mxu1 %v3297_v18  ;;  %v3335_v7 = vand.u32 4294901760, %v3334_v26  ;;  %v3337_v29 = vld [vmem:[#allocation68_spill] sm:$0xff] }
  0xbb   :  { %1079 = vmatpush1.msra.mxu0 %v3299_v25  ;;  %1268 = vmatpush1.msra.mxu1 %v3300_v31  ;;  %v3338_v18 = vand.u32 4294901760, %v3337_v29  ;;  %v3340_v25 = vld [vmem:[#allocation70_spill] sm:$0xff]  ;;  %v3389_v26 = vld [vmem:[#allocation92_spill] sm:$0xff] }
  0xbc   :  { %1083 = vmatprep.subr.mxu0 %v3302_v35  ;;  %1270 = vmatprep.subr.mxu1 %v3303_v37  ;;  %v3341_v31 = vand.u32 4294901760, %v3340_v25  ;;  %v3343_v35 = vld [vmem:[#allocation72_spill] sm:$0xff] }
  0xbd   :  { %1087 = vmatpush1.msra.mxu0 %v3305_v45  ;;  %1272 = vmatpush1.msra.mxu1 %v3306_v59  ;;  %v3344_v37 = vand.u32 4294901760, %v3343_v35  ;;  %v3346_v45 = vld [vmem:[#allocation74_spill] sm:$0xff] }
  0xbe   :  { %1091 = vmatprep.subr.mxu0 %v3308_v3  ;;  %1274 = vmatprep.subr.mxu1 %v3309_v4  ;;  %v3347_v59 = vand.u32 4294901760, %v3346_v45  ;;  %v3349_v3 = vld [vmem:[#allocation76_spill] sm:$0xff] }
  0xbf   :  { %1095 = vmatpush2.msra.mxu0 %v3311_v9  ;;  %1276 = vmatpush1.msra.mxu1 %v3312_v10  ;;  %v3350_v4 = vand.u32 4294901760, %v3349_v3  ;;  %v3352_v9 = vld [vmem:[#allocation78_spill] sm:$0xff] }
  0xc0   :  { %1099 = vmatprep.subr.mxu0 %v3314_v15  ;;  %1278 = vmatprep.subr.mxu1 %v3315_v16  ;;  %v3353_v10 = vand.u32 4294901760, %v3352_v9  ;;  %v3355_v15 = vand.u32 4294901760, %v3354_v11  ;;  %v3356_v16 = vld [vmem:[#allocation80_spill] sm:$0xff] }
  0xc1   :  { %1103 = vmatpush2.msra.mxu0 %v3317_v34  ;;  %1280 = vmatpush1.msra.mxu1 %v3318_v22  ;;  %v3357_v17 = vand.u32 4294901760, %v3356_v16  ;;  %v3358_v34 = vld [vmem:[#allocation82_spill] sm:$0xff] }
  0xc2   :  { %1107 = vmatprep.subr.mxu0 %v3320_v60  ;;  %1282 = vmatprep.subr.mxu1 %v3321_v24  ;;  %v3359_v22 = vand.u32 4294901760, %v3358_v34  ;;  %v3361_v60 = vand.u32 4294901760, %v3360_v55 }
  0xc3   :  { %1111 = vmatpush2.msra.mxu0 %v3323_v42  ;;  %1284 = vmatpush1.msra.mxu1 %v3324_v48 }
  0xc4   :  { %1115 = vmatprep.subr.mxu0 %v3326_v6  ;;  %1286 = vmatprep.subr.mxu1 %v3327_v28 }
  0xc5   :  { %1119 = vmatpush2.msra.mxu0 %v3329_v51  ;;  %1288 = vmatpush1.msra.mxu1 %v3330_v38  ;;  %v3381_v38 = vld [vmem:[#allocation73_spill] sm:$0xff] }
  0xc6   :  { %1123 = vmatprep.subr.mxu0 %v3332_v41  ;;  %1290 = vmatprep.subr.mxu1 %v3333_v44  ;;  %v3384_v41 = vld [vmem:[#allocation75_spill] sm:$0xff]  ;;  %v3387_v44 = vld [vmem:[#allocation90_spill] sm:$0xff] }
  0xc7   :  { %1127 = vmatpush2.msra.mxu0 %v3335_v7  ;;  %1292 = vmatpush2.msra.mxu1 %v3336_v43 }
  0xc8   :  { %1131 = vmatprep.subr.mxu0 %v3338_v18  ;;  %1294 = vmatprep.subr.mxu1 %v3339_v23 }
  0xc9   :  { %1135 = vmatpush2.msra.mxu0 %v3341_v31  ;;  %1296 = vmatpush2.msra.mxu1 %v3342_v54 }
  0xca   :  { %1139 = vmatprep.subr.mxu0 %v3344_v37  ;;  %1298 = vmatprep.subr.mxu1 %v3345_v40 }
  0xcb   :  { %1143 = vmatpush2.msra.mxu0 %v3347_v59  ;;  %1300 = vmatpush2.msra.mxu1 %v3348_v0 }
  0xcc   :  { %1147 = vmatprep.subr.mxu0 %v3350_v4  ;;  %1302 = vmatprep.subr.mxu1 %v3351_v5 }
  0xcd   :  { %1151 = vmatpush2.msra.mxu0 %v3353_v10  ;;  %1304 = vmatpush2.msra.mxu1 %v3227_v20  ;;  %v3362_v20 = vld [vmem:[#allocation86_spill] sm:$0xff] }
  0xce   :  { %1155 = vmatprep.subr.mxu0 %v3355_v15  ;;  %1306 = vmatprep.subr.mxu1 %v3229_v63  ;;  %v3363_v24 = vand.u32 4294901760, %v3362_v20  ;;  %v3364_v63 = vld [vmem:[#allocation87_spill] sm:$0xff] }
  0xcf   :  { %1159 = vmatpush2.msra.mxu0 %v3357_v17  ;;  %1308 = vmatpush2.msra.mxu1 %v3231_v36  ;;  %v3365_v8 = vand.u32 4294901760, %v3364_v63  ;;  %v3366_v36 = vld [vmem:[#allocation88_spill] sm:$0xff] }
  0xd0   :  { %1163 = vmatprep.subr.mxu0 %v3359_v22  ;;  %1310 = vmatprep.subr.mxu1 %v3233_v27  ;;  %v3367_v42 = vand.u32 4294901760, %v3366_v36  ;;  %v3368_v27 = vld [vmem:[#allocation89_spill] sm:$0xff] }
  0xd1   :  { %1167 = vmatpush2.msra.mxu0 %v3361_v60  ;;  %1312 = vmatpush2.msra.mxu1 %v3235_v13  ;;  %v3369_v48 = vand.u32 4294901760, %v3368_v27  ;;  %v3370_v13 = vld [vmem:[#allocation91_spill] sm:$0xff] }
  0xd2   :  { %1171 = vmatprep.subr.mxu0 %v3363_v24  ;;  %1314 = vmatprep.subr.mxu1 %v3237_v53  ;;  %v3371_v21 = vand.u32 4294901760, %v3370_v13  ;;  %v3372_v53 = vld [vmem:[#allocation93_spill] sm:$0xff] }
  0xd3   :  { %1175 = vmatpush2.msra.mxu0 %v3365_v8  ;;  %1316 = vmatpush2.msra.mxu1 %v3238_v32  ;;  %v3373_v6 = vand.u32 4294901760, %v3372_v53  ;;  %v3374_v32 = vld [vmem:[#allocation94_spill] sm:$0xff] }
  0xd4   :  { %1179 = vmatprep.subr.mxu0 %v3367_v42  ;;  %1318 = vmatprep.subr.mxu1 %v3239_v61  ;;  %v3375_v28 = vand.u32 4294901760, %v3374_v32  ;;  %v3376_v61 = vand.u32 4294901760, %v2441_v33 }
  0xd5   :  { %1183 = vmatpush2.msra.mxu0 %v3369_v48  ;;  %1320 = vmatpush2.msra.mxu1 %v3240_v56  ;;  %v3377_v56 = vld [vmem:[#allocation95_spill] sm:$0xff] }
  0xd6   :  { %1187 = vmatprep.subr.mxu0 %v3371_v21  ;;  %1322 = vmatprep.subr.mxu1 %v3241_v47  ;;  %v3378_v46 = vand.u32 4294901760, %v3377_v56  ;;  %v3379_v47 = vld [vmem:[#allocation96_spill] sm:$0xff] }
  0xd7   :  { %1191 = vmatpush2.msra.mxu0 %v3373_v6  ;;  %1324 = vmatpush2.msra.mxu1 %v3242_v57  ;;  %v3380_v51 = vand.u32 4294901760, %v3379_v47  ;;  %v3382_v57 = vld [vmem:[#allocation97_spill] sm:$0xff] }
  0xd8   :  { %1195 = vmatprep.subr.mxu0 %v3375_v28  ;;  %1326 = vmatprep.subr.mxu1 %v3243_v1  ;;  %v3383_v14 = vand.u32 4294901760, %v3382_v57  ;;  %v3385_v1 = vld [vmem:[#allocation98_spill] sm:$0xff] }
  0xd9   :  { %1199 = vmatpush2.msra.mxu0 %v3376_v61  ;;  %1328 = vmatpush2.msra.mxu1 %v3244_v12  ;;  %v3386_v33 = vand.u32 4294901760, %v3385_v1  ;;  %v3388_v12 = vld [vmem:[#allocation77_spill] sm:$0xff] }
  0xda   :  { %1203 = vmatprep.subr.mxu0 %v3378_v46  ;;  %1330 = vmatprep.subr.mxu1 %v3245_v30 }
  0xdb   :  { %1207 = vmatpush2.msra.mxu0 %v3380_v51  ;;  %1332 = vmatpush2.msra.mxu1 %v3381_v38 }
  0xdc   :  { %1211 = vmatprep.subr.mxu0 %v3383_v14  ;;  %1334 = vmatprep.subr.mxu1 %v3384_v41 }
  0xdd   :  { %1215 = vmatpush2.msra.mxu0 %v3386_v33  ;;  %1217 = vmatprep.mubr.f32.mxu0 %v3387_v44 }
  0xde   :  { %1336 = vmatpush2.msra.mxu1 %v3388_v12  ;;  %1219 = vmatmul.mubr.f32.vlgmr.msra.gmra.mxu0 %v3389_v26 }
  0xdf   :  { %1338 = vmatprep.subr.mxu1 %v2278_v2  ;;  %1354 = vmatprep.mubr.f32.mxu1 %v3387_v44 }
  0xe0   :  { %1340 = vmatpush2.msra.mxu1 %v2292_v62 }
  0xe1   :  { %1342 = vmatprep.subr.mxu1 %v3251_v52 }
  0xe2   :  { %1344 = vmatpush2.msra.mxu1 %v3253_v19 }
  0xe3   :  { %1346 = vmatprep.subr.mxu1 %v3255_v50 }
  0xe4   :  { %1348 = vmatpush2.msra.mxu1 %v2356_v58 }
  0xe5   :  { %1350 = vmatprep.subr.mxu1 %v2372_v39 }
  0xe6   :  { %1352 = vmatpush2.msra.mxu1 %v2394_v49 }
  0xe7   :  { %1356 = vmatmul.mubr.f32.vlgmr.msra.gmra.mxu1 %v3389_v26 }
 0x11c   :  { %v218_v30 = vpop.f32.mrf.mxu0 }
 0x11e   :  { %v220_v2 = vpop.f32.mrf.mxu0 }
 0x124   :  { %v611_v7 = vpop.f32.mrf.mxu1 }
 0x125   :  { %v612_v52 = vadd.f32 %v611_v7, %v218_v30 }
 0x126   :  { %v613_v29 = vpop.f32.mrf.mxu1 }
 0x127   :  { %v614_v19 = vadd.f32 %v613_v29, %v220_v2 }
 0x15c   :  { %v814_v43 = vpop.f32.mrf.mxu0 }
 0x15d   :  { %v815_v25 = vadd.f32 %v814_v43, %v612_v52 }
 0x15e   :  { %v816_v62 = vpop.f32.mrf.mxu0 }
 0x15f   :  { %v817_v31 = vadd.f32 %v816_v62, %v614_v19 }
 0x165   :  { %v955_v18 = vpop.f32.mrf.mxu1 }
 0x166   :  { %v956_v58 = vadd.f32 %v955_v18, %v815_v25 }
 0x167   :  { %v957_v50 = vpop.f32.mrf.mxu1 }
 0x168   :  { %v958_v39 = vadd.f32 %v957_v50, %v817_v31 }
 0x19e   :  { %v1220_v23 = vpop.f32.mrf.mxu0 }
 0x19f   :  { %v1221_v35 = vadd.f32 %v1220_v23, %v956_v58 }
 0x1a0   :  { %v1222_v54 = vpop.f32.mrf.mxu0 }
 0x1a1   :  { %v1223_v37 = vadd.f32 %v1222_v54, %v958_v39 }
 0x1a7   :  { %v1357_v49 = vpop.f32.mrf.mxu1 }
 0x1a8   :  { %v1358_v40 = vadd.f32 %v1357_v49, %v1221_v35 }
 0x1a9   :  { %v1359_v45 = vpop.f32.mrf.mxu1 }
 0x1aa   :  { %1362 = vst [vmem:[#allocation2] sm:$0xff] %v1358_v40  ;;  %v1360_v59 = vadd.f32 %v1359_v45, %v1223_v37 }
 0x1ac   :  { %1364 = vst.msk [vmem:[#allocation2 + $0x8] sm:$0xff] %vm1363_vm0, %v1360_v59 }
 0x1ad   :  { %1391 = shalt.err (!%p1388_p4)
}
 0x1ae   :  { %1374 = dma.vmem_to_hbm [thread:$0]  %s1372_s28, 256, %s2831_s2, [#allocation3]  }
 0x1af   :  { %1400 = dma.done.wait [#allocation3], 256  }
 0x1b0   :  { %1401 = vsyncadd [#allocation3], 4294967040 }
 0x1b1   :  { %1378 = vsyncpa [#allocation3], 1 }

// kernel: tpu_custom_call.1
= control target key start
LH: loop header
LB: loop body
LE: loop exit
PB: predicated region body
PF: predicated region fallthrough
CT: control target
= control target key end

     0   :  { %s406_s0 = inlined_call_operand.vmem [shape: f32[256,169], index: 0, kind: input, shape index: {}]   ;;  %s407_s1 = inlined_call_operand.vmem [shape: f32[8,256], index: 1, kind: input, shape index: {}]   ;;  %s408_s2 = inlined_call_operand.hbm [shape: f32[8,169], index: 2, kind: output, shape index: {}]  }
   0x1   :  { %v45_v0 = vld [vmem:[%s406_s0 + $0xf8] sm:$0xff]  ;;  %v44_v1 = vld [vmem:[%s406_s0 + $0xf0] sm:$0xff]  ;;  %v43_v2 = vld [vmem:[%s406_s0 + $0xe8] sm:$0xff] }
   0x2   :  { %78 = vmatprep.subr.mxu0 %v45_v0  ;;  %v42_v3 = vld [vmem:[%s406_s0 + $0xe0] sm:$0xff]  ;;  %v41_v4 = vld [vmem:[%s406_s0 + $0xd8] sm:$0xff]  ;;  %v40_v5 = vld [vmem:[%s406_s0 + $0xd0] sm:$0xff] }
   0x3   :  { %79 = vmatpush1.msra.mxu0 %v44_v1  ;;  %v39_v6 = vld [vmem:[%s406_s0 + $0xc8] sm:$0xff]  ;;  %v38_v7 = vld [vmem:[%s406_s0 + $0xc0] sm:$0xff]  ;;  %v37_v8 = vld [vmem:[%s406_s0 + $0xb8] sm:$0xff] }
   0x4   :  { %80 = vmatprep.subr.mxu0 %v43_v2  ;;  %v36_v9 = vld [vmem:[%s406_s0 + $0xb0] sm:$0xff]  ;;  %v35_v10 = vld [vmem:[%s406_s0 + $0xa8] sm:$0xff]  ;;  %v34_v11 = vld [vmem:[%s406_s0 + $0xa0] sm:$0xff] }
   0x5   :  { %81 = vmatpush1.msra.mxu0 %v42_v3  ;;  %v33_v12 = vld [vmem:[%s406_s0 + $0x98] sm:$0xff]  ;;  %v32_v13 = vld [vmem:[%s406_s0 + $0x90] sm:$0xff]  ;;  %v31_v14 = vld [vmem:[%s406_s0 + $0x88] sm:$0xff] }
   0x6   :  { %82 = vmatprep.subr.mxu0 %v41_v4  ;;  %v30_v15 = vld [vmem:[%s406_s0 + $0x80] sm:$0xff]  ;;  %v29_v16 = vld [vmem:[%s406_s0 + $0x78] sm:$0xff]  ;;  %v28_v17 = vld [vmem:[%s406_s0 + $0x70] sm:$0xff] }
   0x7   :  { %83 = vmatpush1.msra.mxu0 %v40_v5  ;;  %v27_v18 = vld [vmem:[%s406_s0 + $0x68] sm:$0xff]  ;;  %v26_v19 = vld [vmem:[%s406_s0 + $0x60] sm:$0xff]  ;;  %v25_v20 = vld [vmem:[%s406_s0 + $0x58] sm:$0xff] }
   0x8   :  { %84 = vmatprep.subr.mxu0 %v39_v6  ;;  %v24_v21 = vld [vmem:[%s406_s0 + $0x50] sm:$0xff]  ;;  %v23_v22 = vld [vmem:[%s406_s0 + $0x48] sm:$0xff]  ;;  %v22_v23 = vld [vmem:[%s406_s0 + $0x40] sm:$0xff] }
   0x9   :  { %85 = vmatpush1.msra.mxu0 %v38_v7  ;;  %v13_v24 = vld [vmem:[%s407_s1 + $0x8] sm:$0xff]  ;;  %v21_v25 = vld [vmem:[%s406_s0 + $0x38] sm:$0xff] }
   0xa   :  { %86 = vmatprep.subr.mxu0 %v37_v8  ;;  %142 = vmatprep.mubr.f32.mxu0 %v13_v24 }
   0xb   :  { %87 = vmatpush1.msra.mxu0 %v36_v9 }
   0xc   :  { %88 = vmatprep.subr.mxu0 %v35_v10 }
   0xd   :  { %89 = vmatpush1.msra.mxu0 %v34_v11 }
   0xe   :  { %90 = vmatprep.subr.mxu0 %v33_v12 }
   0xf   :  { %91 = vmatpush1.msra.mxu0 %v32_v13 }
  0x10   :  { %92 = vmatprep.subr.mxu0 %v31_v14 }
  0x11   :  { %93 = vmatpush1.msra.mxu0 %v30_v15 }
  0x12   :  { %94 = vmatprep.subr.mxu0 %v29_v16 }
  0x13   :  { %95 = vmatpush1.msra.mxu0 %v28_v17 }
  0x14   :  { %96 = vmatprep.subr.mxu0 %v27_v18 }
  0x15   :  { %97 = vmatpush1.msra.mxu0 %v26_v19 }
  0x16   :  { %98 = vmatprep.subr.mxu0 %v25_v20 }
  0x17   :  { %99 = vmatpush1.msra.mxu0 %v24_v21 }
  0x18   :  { %7 = vsyncpa [#allocation3], 0  ;;  %100 = vmatprep.subr.mxu0 %v23_v22  ;;  %v20_v26 = vld [vmem:[%s406_s0 + $0x30] sm:$0xff]  ;;  %v19_v27 = vld [vmem:[%s406_s0 + $0x28] sm:$0xff]  ;;  %s189_s29 = smov [#allocation2]   ;;  %vm150_vm0 = vcmask 334848  }
  0x19   :  { %101 = vmatpush1.msra.mxu0 %v22_v23  ;;  %v18_v28 = vld [vmem:[%s406_s0 + $0x20] sm:$0xff]  ;;  %v17_v29 = vld [vmem:[%s406_s0 + $0x18] sm:$0xff]  ;;  %v16_v30 = vld [vmem:[%s406_s0 + $0x10] sm:$0xff]  ;;  %s158_s30 = sshll.u32 %s189_s29, 4  ;;  %s159_s30 = int_to_ptr.vmem [resolvable:$true] %s158_s30 }
  0x1a   :  { %102 = vmatprep.subr.mxu0 %v21_v25  ;;  %v15_v31 = vld [vmem:[%s406_s0 + $0x8] sm:$0xff]  ;;  %v14_v32 = vld [vmem:[%s406_s0] sm:$0xff]  ;;  %v77_v33 = vld [vmem:[%s406_s0 + $0x1f8] sm:$0xff]  ;;  %s167_s3 = scalar_lea.vmem %s159_s30, 256  ;;  %p172_p1 = scmp.lt.s32.totalorder %s159_s30, %s159_s30 }
  0x1b   :  { %103 = vmatpush1.msra.mxu0 %v20_v26  ;;  %v76_v34 = vld [vmem:[%s406_s0 + $0x1f0] sm:$0xff]  ;;  %v75_v35 = vld [vmem:[%s406_s0 + $0x1e8] sm:$0xff]  ;;  %v74_v36 = vld [vmem:[%s406_s0 + $0x1e0] sm:$0xff]  ;;  %p168_p0 = scmp.ne.s32.totalorder %s159_s30, %s167_s3  ;;  %p173_p2 = scmp.lt.s32.totalorder %s167_s3, %s167_s3 }
  0x1c   :  { %104 = vmatprep.subr.mxu0 %v19_v27  ;;  %v73_v37 = vld [vmem:[%s406_s0 + $0x1d8] sm:$0xff]  ;;  %v72_v38 = vld [vmem:[%s406_s0 + $0x1d0] sm:$0xff]  ;;  %v71_v39 = vld [vmem:[%s406_s0 + $0x1c8] sm:$0xff] }
  0x1d   :  { %105 = vmatpush1.msra.mxu0 %v18_v28  ;;  %v70_v40 = vld [vmem:[%s406_s0 + $0x1c0] sm:$0xff]  ;;  %v69_v41 = vld [vmem:[%s406_s0 + $0x1b8] sm:$0xff]  ;;  %v68_v42 = vld [vmem:[%s406_s0 + $0x1b0] sm:$0xff]  ;;  %p174_p3 = por %p173_p2, %p172_p1 }
  0x1e   :  { %106 = vmatprep.subr.mxu0 %v17_v29  ;;  %v67_v43 = vld [vmem:[%s406_s0 + $0x1a8] sm:$0xff]  ;;  %v66_v44 = vld [vmem:[%s406_s0 + $0x1a0] sm:$0xff]  ;;  %v65_v45 = vld [vmem:[%s406_s0 + $0x198] sm:$0xff] }
  0x1f   :  { %107 = vmatpush1.msra.mxu0 %v16_v30  ;;  %v64_v46 = vld [vmem:[%s406_s0 + $0x190] sm:$0xff]  ;;  %v63_v47 = vld [vmem:[%s406_s0 + $0x188] sm:$0xff]  ;;  %v62_v48 = vld [vmem:[%s406_s0 + $0x180] sm:$0xff]  ;;  %p175_p4 = pnand %p174_p3, %p168_p0 }
  0x20   :  { %108 = vmatprep.subr.mxu0 %v15_v31  ;;  %v61_v49 = vld [vmem:[%s406_s0 + $0x178] sm:$0xff]  ;;  %v60_v50 = vld [vmem:[%s406_s0 + $0x170] sm:$0xff]  ;;  %v59_v51 = vld [vmem:[%s406_s0 + $0x168] sm:$0xff] }
  0x21   :  { %109 = vmatpush1.msra.mxu0 %v14_v32  ;;  %v58_v52 = vld [vmem:[%s406_s0 + $0x160] sm:$0xff]  ;;  %v57_v53 = vld [vmem:[%s406_s0 + $0x158] sm:$0xff]  ;;  %v56_v54 = vld [vmem:[%s406_s0 + $0x150] sm:$0xff] }
  0x22   :  { %110 = vmatprep.subr.mxu0 %v77_v33  ;;  %v55_v55 = vld [vmem:[%s406_s0 + $0x148] sm:$0xff]  ;;  %v54_v56 = vld [vmem:[%s406_s0 + $0x140] sm:$0xff]  ;;  %v53_v57 = vld [vmem:[%s406_s0 + $0x138] sm:$0xff] }
  0x23   :  { %111 = vmatpush2.msra.mxu0 %v76_v34  ;;  %v52_v58 = vld [vmem:[%s406_s0 + $0x130] sm:$0xff]  ;;  %v51_v59 = vld [vmem:[%s406_s0 + $0x128] sm:$0xff]  ;;  %v50_v60 = vld [vmem:[%s406_s0 + $0x120] sm:$0xff] }
  0x24   :  { %112 = vmatprep.subr.mxu0 %v75_v35  ;;  %v49_v61 = vld [vmem:[%s406_s0 + $0x118] sm:$0xff]  ;;  %v48_v62 = vld [vmem:[%s406_s0 + $0x110] sm:$0xff]  ;;  %v47_v63 = vld [vmem:[%s406_s0 + $0x108] sm:$0xff] }
  0x25   :  { %113 = vmatpush2.msra.mxu0 %v74_v36  ;;  %v46_v0 = vld [vmem:[%s406_s0 + $0x100] sm:$0xff] }
  0x26   :  { %114 = vmatprep.subr.mxu0 %v73_v37  ;;  %v12_v1 = vld [vmem:[%s407_s1] sm:$0xff] }
  0x27   :  { %115 = vmatpush2.msra.mxu0 %v72_v38 }
  0x28   :  { %116 = vmatprep.subr.mxu0 %v71_v39 }
  0x29   :  { %117 = vmatpush2.msra.mxu0 %v70_v40 }
  0x2a   :  { %118 = vmatprep.subr.mxu0 %v69_v41 }
  0x2b   :  { %119 = vmatpush2.msra.mxu0 %v68_v42 }
  0x2c   :  { %120 = vmatprep.subr.mxu0 %v67_v43 }
  0x2d   :  { %121 = vmatpush2.msra.mxu0 %v66_v44 }
  0x2e   :  { %122 = vmatprep.subr.mxu0 %v65_v45 }
  0x2f   :  { %123 = vmatpush2.msra.mxu0 %v64_v46 }
  0x30   :  { %124 = vmatprep.subr.mxu0 %v63_v47 }
  0x31   :  { %125 = vmatpush2.msra.mxu0 %v62_v48 }
  0x32   :  { %126 = vmatprep.subr.mxu0 %v61_v49 }
  0x33   :  { %127 = vmatpush2.msra.mxu0 %v60_v50 }
  0x34   :  { %128 = vmatprep.subr.mxu0 %v59_v51 }
  0x35   :  { %129 = vmatpush2.msra.mxu0 %v58_v52 }
  0x36   :  { %130 = vmatprep.subr.mxu0 %v57_v53 }
  0x37   :  { %131 = vmatpush2.msra.mxu0 %v56_v54 }
  0x38   :  { %132 = vmatprep.subr.mxu0 %v55_v55 }
  0x39   :  { %133 = vmatpush2.msra.mxu0 %v54_v56 }
  0x3a   :  { %134 = vmatprep.subr.mxu0 %v53_v57 }
  0x3b   :  { %135 = vmatpush2.msra.mxu0 %v52_v58 }
  0x3c   :  { %136 = vmatprep.subr.mxu0 %v51_v59 }
  0x3d   :  { %137 = vmatpush2.msra.mxu0 %v50_v60 }
  0x3e   :  { %138 = vmatprep.subr.mxu0 %v49_v61 }
  0x3f   :  { %139 = vmatpush2.msra.mxu0 %v48_v62 }
  0x40   :  { %140 = vmatprep.subr.mxu0 %v47_v63 }
  0x41   :  { %141 = vmatpush2.msra.mxu0 %v46_v0 }
  0x42   :  { %143 = vmatmul.mubr.f32.vlgmr.msra.gmra.mxu0 %v12_v1 }
 0x102   :  { %v144_v2 = vpop.f32.mrf.mxu0 }
 0x103   :  { %149 = vst [vmem:[#allocation2] sm:$0xff] %v144_v2 }
 0x104   :  { %v146_v3 = vpop.f32.mrf.mxu0 }
 0x105   :  { %151 = vst.msk [vmem:[#allocation2 + $0x8] sm:$0xff] %vm150_vm0, %v146_v3 }
 0x106   :  { %178 = shalt.err (!%p175_p4)
}
 0x107   :  { %161 = dma.vmem_to_hbm [thread:$0]  %s159_s30, 256, %s408_s2, [#allocation3]  }
 0x108   :  { %187 = dma.done.wait [#allocation3], 256  }
 0x109   :  { %188 = vsyncadd [#allocation3], 4294967040 }
 0x10a   :  { %165 = vsyncpa [#allocation3], 1 }

</bundles_post_ra>
